<compile_context>
chip_gen: v7x
topology: tpu7x:2x2x1
jax: 0.10.0
libtpu: 0.0.40
codegen_flags: <defaults>
</compile_context>

<pallas_src>
import functools

import jax
import jax.numpy as jnp
from jax import lax
from jax.experimental import pallas as pl
from jax.experimental.pallas import tpu as pltpu

LANES = 128
NEG_SLOPE = 0.2  # PyG GATv2Conv default negative_slope


def _leaky(z, ns):
    # leaky_relu(z) == max(z, ns*z) for 0 < ns < 1
    return jnp.maximum(z, ns * z)


def _fused_gcn_kernel(
        x_ref, xt_ref, adjb_ref,
        w1l_ref, b1l_ref, w1lt_ref, b1lt_ref, w1r_ref, b1r_ref, a1_ref, c1_ref,
        w2l_ref, b2l_ref, w2lt_ref, b2lt_ref, w2r_ref, b2r_ref, a2_ref, c2_ref,
        out_ref,
        x2lp_ref, x2lt_s_ref, x2r_ref,
        *, negative_slope):
    i = pl.program_id(0)           # "parallel" row-group axis (megacore)
    j = pl.program_id(1)           # "arbitrary" row-block axis within the group
    n_inner = pl.num_programs(1)
    block_rows = out_ref.shape[0]
    hid = w1l_ref.shape[1]
    out_f = a2_ref.shape[1]

    # -------- once-per-row-group phase: layer 1 + hoisted layer-2 projections
    @pl.when(j == 0)
    def _():
        x_bf = x_ref[...].astype(jnp.bfloat16)             # (N, Fin)
        xt_bf = xt_ref[...].astype(jnp.bfloat16)           # (Fin, N)
        adjb = adjb_ref[...].astype(jnp.float32)           # (N, N) additive 0 / -1e30

        x1l = jnp.dot(x_bf, w1l_ref[...],
                      preferred_element_type=jnp.float32) + b1l_ref[...]     # (N, HID)
        x1r = jnp.dot(x_bf, w1r_ref[...],
                      preferred_element_type=jnp.float32) + b1r_ref[...]     # (N, HID)
        # Source-side projection laid out lane-major (HID, N): plain matmul with
        # pre-transposed weights -> no in-kernel transpose needed.
        x1lt = jnp.dot(w1lt_ref[...], xt_bf,
                       preferred_element_type=jnp.float32) + b1lt_ref[...]   # (HID, N)

        # GATv2 logits as channel-accumulated lane-dense (N_tgt, N_src) planes.
        a1 = a1_ref[...]                                    # (1, HID)
        logits = adjb
        for c in range(hid):
            plane = x1r[:, c:c + 1] + x1lt[c:c + 1, :]      # (N,1)+(1,N) -> (N,N)
            logits = logits + a1[:, c:c + 1] * _leaky(plane, negative_slope)

        m = jnp.max(logits, axis=-1, keepdims=True)         # finite: self-loops present
        p = jnp.exp(logits - m)                             # non-edges underflow to 0
        alpha = p * pl.reciprocal(jnp.sum(p, axis=-1, keepdims=True), approx=False)

        h = jnp.dot(alpha.astype(jnp.bfloat16), x1l.astype(jnp.bfloat16),
                    preferred_element_type=jnp.float32) + c1_ref[...]
        h_bf = jnp.maximum(h, 0.0).astype(jnp.bfloat16)     # ReLU; dropout = identity (eval)

        # Hoisted layer-2 projections, persisted in VMEM scratch for all blocks.
        x2lp_ref[...] = jnp.dot(h_bf, w2l_ref[...],
                                preferred_element_type=jnp.float32) + b2l_ref[...]   # (N, 128)
        x2r_ref[...] = jnp.dot(h_bf, w2r_ref[...],
                               preferred_element_type=jnp.float32) + b2r_ref[...]    # (N, OUT_F)
        # True-width source-side scores, lane-major (OUT_F, N): contraction over
        # HID of (OUT_F,HID) x (N,HID), i.e. w2l_true.T @ h.T without a transpose.
        x2lt_s_ref[...] = lax.dot_general(
            w2lt_ref[...], h_bf, (((1,), (1,)), ((), ())),
            preferred_element_type=jnp.float32) + b2lt_ref[...]                       # (OUT_F, N)

    # -------- per-block phase: layer-2 attention for this block's target rows
    rb = i * n_inner + j
    row0 = pl.multiple_of(rb * block_rows, block_rows)

    x2r_blk = x2r_ref[pl.ds(row0, block_rows), :]           # (TI, OUT_F)
    x2lt = x2lt_s_ref[...]                                   # (OUT_F, N)
    a2 = a2_ref[...]                                         # (1, OUT_F)
    logits2 = adjb_ref[pl.ds(row0, block_rows), :].astype(jnp.float32)   # (TI, N)
    for c in range(out_f):                                   # true OUT_F width, not 128
        plane = x2r_blk[:, c:c + 1] + x2lt[c:c + 1, :]       # (TI,1)+(1,N) -> (TI,N)
        logits2 = logits2 + a2[:, c:c + 1] * _leaky(plane, negative_slope)

    m2 = jnp.max(logits2, axis=-1, keepdims=True)
    p2 = jnp.exp(logits2 - m2)
    alpha2 = p2 * pl.reciprocal(jnp.sum(p2, axis=-1, keepdims=True), approx=False)

    out = jnp.dot(alpha2.astype(jnp.bfloat16), x2lp_ref[...].astype(jnp.bfloat16),
                  preferred_element_type=jnp.float32) + c2_ref[...]        # (TI, 128)
    out_ref[...] = jax.nn.sigmoid(out)                       # lane-dense (8,128) store


def _full_spec(arr):
    nd = arr.ndim
    return pl.BlockSpec(arr.shape, lambda *_, nd=nd: (0,) * nd)


def _vmem_limit_bytes():
    # Per-generation budget: ~75% of physical VMEM (64 MiB v7x, 128 MiB v5e/v6e),
    # well above the 16/32 MiB default scoped limits.
    try:
        cap = pltpu.get_tpu_info().vmem_capacity_bytes
    except Exception:
        cap = 64 * 1024 * 1024
    return int(cap * 3 // 4)


def gcn_forward(x, adj_bias, p1, p2, *, out_features, dropout_rate=0.0,
                block_rows=128, num_row_groups=2):
    """x: (N, Fin) f32; adj_bias: (N, N) bf16 additive mask (0 on edges, -1e30 off).

    num_row_groups is the "parallel" grid axis (>= number of TensorCores, e.g.
    2 for v7x megacore); layer 1 is recomputed once per row group.
    """
    del dropout_rate  # TODO(synk): training-mode dropout not modeled (inference).
    n, in_f = x.shape
    hid = p1["wl"].shape[1]
    out_f = p2["att"].shape[1]

    block_rows = max(8, min(block_rows, n // num_row_groups))
    assert block_rows % 8 == 0, "block_rows must be a multiple of 8"
    assert n % (num_row_groups * block_rows) == 0, \
        "N must be a multiple of num_row_groups * block_rows"
    n_inner = n // (num_row_groups * block_rows)
    grid = (num_row_groups, n_inner)

    xt = jnp.transpose(x)  # (Fin, N): lets the kernel build x1l lane-major via matmul

    operands = (
        x, xt, adj_bias,
        p1["wl"], p1["bl"], p1["wlt"], p1["blt"],
        p1["wr"], p1["br"], p1["att"], p1["bias"],
        p2["wl"], p2["bl"], p2["wlt"], p2["blt"],
        p2["wr"], p2["br"], p2["att"], p2["bias"],
    )
    in_specs = [_full_spec(a) for a in operands]
    out_specs = pl.BlockSpec((block_rows, LANES), lambda i, j: (i * n_inner + j, 0))

    flops = int(6 * n * in_f * hid               # layer-1 projections
                + 8 * n * n * hid                # layer-1 pairwise planes
                + 2 * n * n * hid                # alpha @ x1l
                + 2 * n * hid * (LANES + 2 * out_f)   # layer-2 projections
                + 8 * n * n * out_f              # layer-2 planes
                + 2 * n * n * LANES)             # alpha2 @ x2l_pad
    transcendentals = int(2 * n * n + n * LANES)
    bytes_accessed = int(sum(a.size * a.dtype.itemsize for a in operands)
                         + n * LANES * 4)

    kernel = functools.partial(_fused_gcn_kernel, negative_slope=NEG_SLOPE)
    out_padded = pl.pallas_call(
        kernel,
        out_shape=jax.ShapeDtypeStruct((n, LANES), jnp.float32),
        grid=grid,
        in_specs=in_specs,
        out_specs=out_specs,
        scratch_shapes=[
            pltpu.VMEM((n, LANES), jnp.float32),   # x2l zero-padded to 128 lanes
            pltpu.VMEM((out_f, n), jnp.float32),   # x2l true-width, lane-major
            pltpu.VMEM((n, out_f), jnp.float32),   # x2r true-width
        ],
        compiler_params=pltpu.CompilerParams(
            dimension_semantics=("parallel", "arbitrary"),
            vmem_limit_bytes=_vmem_limit_bytes()),
        cost_estimate=pl.CostEstimate(flops=flops,
                                      transcendentals=transcendentals,
                                      bytes_accessed=bytes_accessed),
    )(*operands)

    out = jnp.squeeze(out_padded[:, :out_features])   # drop lane padding, squeeze
    return out, out, out


def _glorot(key, shape):
    fan_in, fan_out = shape
    limit = (6.0 / (fan_in + fan_out)) ** 0.5
    return jax.random.uniform(key, shape, jnp.float32, -limit, limit)


def init_gatv2(key, in_c, out_c):
    k0, k1, k2 = jax.random.split(key, 3)
    return dict(
        wl=_glorot(k0, (in_c, out_c)), bl=jnp.zeros((1, out_c), jnp.float32),
        wr=_glorot(k1, (in_c, out_c)), br=jnp.zeros((1, out_c), jnp.float32),
        att=_glorot(k2, (1, out_c)),   bias=jnp.zeros((1, out_c), jnp.float32),
    )


def prepare_layer1(p):
    """bf16-cast the MXU weights and add a pre-transposed left projection so the
    kernel gets source-side scores lane-major without an in-kernel transpose."""
    return dict(
        wl=p["wl"].astype(jnp.bfloat16),   bl=p["bl"],
        wlt=p["wl"].T.astype(jnp.bfloat16), blt=p["bl"].T,      # (HID,Fin), (HID,1)
        wr=p["wr"].astype(jnp.bfloat16),   br=p["br"],
        att=p["att"],                      bias=p["bias"],
    )


def prepare_layer2(p, pad_to=LANES):
    """Layer 2: attention runs at the true OUT_F width; only the aggregation
    weights/biases are zero-padded to `pad_to` lanes for a lane-dense output."""
    out_c = p["wl"].shape[1]
    pad = pad_to - out_c
    padw = lambda w: jnp.pad(w, ((0, 0), (0, pad)))
    return dict(
        wl=padw(p["wl"]).astype(jnp.bfloat16), bl=padw(p["bl"]),    # (HID,128),(1,128)
        wlt=p["wl"].T.astype(jnp.bfloat16),    blt=p["bl"].T,       # (OUT,HID),(OUT,1)
        wr=p["wr"].astype(jnp.bfloat16),       br=p["br"],          # (HID,OUT),(1,OUT)
        att=p["att"],                          bias=padw(p["bias"]),  # (1,OUT),(1,128)
    )


if __name__ == "__main__":
    key = jax.random.PRNGKey(0)
    N, IN_F, HID, OUT_F, E = 16, 8, 32, 1, 40
    kx, ke, k1, k2 = jax.random.split(key, 4)

    # Deterministic synthetic graph: node features + random directed edges.
    x = jax.random.normal(kx, (N, IN_F), jnp.float32)
    src = jax.random.randint(ke, (E,), 0, N)
    dst = jax.random.randint(jax.random.fold_in(ke, 1), (E,), 0, N)
    edge_index = jnp.stack([src, dst])                   # (2, E), PyG convention

    # Dense adjacency (adj[dst, src] = 1, plus self-loops as in GATv2Conv),
    # converted to an additive attention bias: 0 on edges, -1e30 elsewhere.
    adj = jnp.zeros((N, N), jnp.float32)
    adj = adj.at[edge_index[1], edge_index[0]].set(1.0)
    adj = adj.at[jnp.arange(N), jnp.arange(N)].set(1.0)
    adj_bias = jnp.where(adj > 0, 0.0, -1e30).astype(jnp.bfloat16)

    params1 = prepare_layer1(init_gatv2(k1, IN_F, HID))
    params2 = prepare_layer2(init_gatv2(k2, HID, OUT_F))

    out_a, out_b, out_c = gcn_forward(x, adj_bias, params1, params2,
                                      out_features=OUT_F, dropout_rate=0.5)
    jax.block_until_ready(out_a)
    assert out_a.shape == (N,)
    assert bool(jnp.all(jnp.isfinite(out_a)))
    print("KERNEL_OK")
</pallas_src>

<mosaic_0001>
module attributes {stable_mosaic.version = 11 : i64} {
  func.func @_fused_gcn_kernel(%arg0: i32, %arg1: i32, %arg2: memref<16x8xf32, #tpu.memory_space<vmem>>, %arg3: memref<8x16xf32, #tpu.memory_space<vmem>>, %arg4: memref<16x16xbf16, #tpu.memory_space<vmem>>, %arg5: memref<8x32xbf16, #tpu.memory_space<vmem>>, %arg6: memref<1x32xf32, #tpu.memory_space<vmem>>, %arg7: memref<32x8xbf16, #tpu.memory_space<vmem>>, %arg8: memref<32x1xf32, #tpu.memory_space<vmem>>, %arg9: memref<8x32xbf16, #tpu.memory_space<vmem>>, %arg10: memref<1x32xf32, #tpu.memory_space<vmem>>, %arg11: memref<1x32xf32, #tpu.memory_space<vmem>>, %arg12: memref<1x32xf32, #tpu.memory_space<vmem>>, %arg13: memref<32x128xbf16, #tpu.memory_space<vmem>>, %arg14: memref<1x128xf32, #tpu.memory_space<vmem>>, %arg15: memref<1x32xbf16, #tpu.memory_space<vmem>>, %arg16: memref<1x1xf32, #tpu.memory_space<vmem>>, %arg17: memref<32x1xbf16, #tpu.memory_space<vmem>>, %arg18: memref<1x1xf32, #tpu.memory_space<vmem>>, %arg19: memref<1x1xf32, #tpu.memory_space<vmem>>, %arg20: memref<1x128xf32, #tpu.memory_space<vmem>>, %arg21: memref<8x128xf32, #tpu.memory_space<vmem>>, %arg22: memref<16x128xf32, #tpu.memory_space<vmem>>, %arg23: memref<1x16xf32, #tpu.memory_space<vmem>>, %arg24: memref<16x1xf32, #tpu.memory_space<vmem>>) attributes {dimension_semantics = [#tpu.dimension_semantics<parallel>, #tpu.dimension_semantics<arbitrary>], iteration_bounds = array<i64: 2, 1>, scalar_prefetch = 0 : i64, scratch_operands = 3 : i64, tpu.core_type = #tpu.core_type<tc>, window_params = [{pipeline_mode = #tpu.pipeline_mode<synchronous>, transform_indices = @transform_0, window_bounds = array<i64: 16, 8>}, {pipeline_mode = #tpu.pipeline_mode<synchronous>, transform_indices = @transform_1, window_bounds = array<i64: 8, 16>}, {pipeline_mode = #tpu.pipeline_mode<synchronous>, transform_indices = @transform_2, window_bounds = array<i64: 16, 16>}, {pipeline_mode = #tpu.pipeline_mode<synchronous>, transform_indices = @transform_3, window_bounds = array<i64: 8, 32>}, {pipeline_mode = #tpu.pipeline_mode<synchronous>, transform_indices = @transform_4, window_bounds = array<i64: 1, 32>}, {pipeline_mode = #tpu.pipeline_mode<synchronous>, transform_indices = @transform_5, window_bounds = array<i64: 32, 8>}, {pipeline_mode = #tpu.pipeline_mode<synchronous>, transform_indices = @transform_6, window_bounds = array<i64: 32, 1>}, {pipeline_mode = #tpu.pipeline_mode<synchronous>, transform_indices = @transform_7, window_bounds = array<i64: 8, 32>}, {pipeline_mode = #tpu.pipeline_mode<synchronous>, transform_indices = @transform_8, window_bounds = array<i64: 1, 32>}, {pipeline_mode = #tpu.pipeline_mode<synchronous>, transform_indices = @transform_9, window_bounds = array<i64: 1, 32>}, {pipeline_mode = #tpu.pipeline_mode<synchronous>, transform_indices = @transform_10, window_bounds = array<i64: 1, 32>}, {pipeline_mode = #tpu.pipeline_mode<synchronous>, transform_indices = @transform_11, window_bounds = array<i64: 32, 128>}, {pipeline_mode = #tpu.pipeline_mode<synchronous>, transform_indices = @transform_12, window_bounds = array<i64: 1, 128>}, {pipeline_mode = #tpu.pipeline_mode<synchronous>, transform_indices = @transform_13, window_bounds = array<i64: 1, 32>}, {pipeline_mode = #tpu.pipeline_mode<synchronous>, transform_indices = @transform_14, window_bounds = array<i64: 1, 1>}, {pipeline_mode = #tpu.pipeline_mode<synchronous>, transform_indices = @transform_15, window_bounds = array<i64: 32, 1>}, {pipeline_mode = #tpu.pipeline_mode<synchronous>, transform_indices = @transform_16, window_bounds = array<i64: 1, 1>}, {pipeline_mode = #tpu.pipeline_mode<synchronous>, transform_indices = @transform_17, window_bounds = array<i64: 1, 1>}, {pipeline_mode = #tpu.pipeline_mode<synchronous>, transform_indices = @transform_18, window_bounds = array<i64: 1, 128>}, {transform_indices = @transform_19, window_bounds = array<i64: 8, 128>}]} {
    %c0_i32 = arith.constant 0 : i32
    %0 = arith.cmpi eq, %arg1, %c0_i32 : i32
    %1 = arith.extui %0 : i1 to i32
    %c0_i32_0 = arith.constant 0 : i32
    %2 = arith.cmpi ne, %1, %c0_i32_0 : i32
    scf.if %2 {
      %c0_16 = arith.constant 0 : index
      %c0_17 = arith.constant 0 : index
      %46 = vector.load %arg2[%c0_16, %c0_17] : memref<16x8xf32, #tpu.memory_space<vmem>>, vector<16x8xf32>
      %47 = arith.truncf %46 : vector<16x8xf32> to vector<16x8xbf16>
      %c0_18 = arith.constant 0 : index
      %c0_19 = arith.constant 0 : index
      %48 = vector.load %arg3[%c0_18, %c0_19] : memref<8x16xf32, #tpu.memory_space<vmem>>, vector<8x16xf32>
      %49 = arith.truncf %48 : vector<8x16xf32> to vector<8x16xbf16>
      %c0_20 = arith.constant 0 : index
      %c0_21 = arith.constant 0 : index
      %50 = vector.load %arg4[%c0_20, %c0_21] : memref<16x16xbf16, #tpu.memory_space<vmem>>, vector<16x16xbf16>
      %51 = arith.extf %50 : vector<16x16xbf16> to vector<16x16xf32>
      %c0_22 = arith.constant 0 : index
      %c0_23 = arith.constant 0 : index
      %52 = vector.load %arg5[%c0_22, %c0_23] : memref<8x32xbf16, #tpu.memory_space<vmem>>, vector<8x32xbf16>
      %cst_24 = arith.constant dense<0.000000e+00> : vector<16x32xf32>
      %53 = tpu.matmul %47, %52, %cst_24 {dimension_numbers = #tpu.dot_dimension_numbers<[1], [0], [0], [1], [0, 0, 1, 1], [], []>} : vector<16x8xbf16>, vector<8x32xbf16>, vector<16x32xf32> -> vector<16x32xf32>
      %c0_25 = arith.constant 0 : index
      %c0_26 = arith.constant 0 : index
      %54 = vector.load %arg6[%c0_25, %c0_26] : memref<1x32xf32, #tpu.memory_space<vmem>>, vector<1x32xf32>
      %55 = vector.broadcast %54 : vector<1x32xf32> to vector<16x32xf32>
      %56 = arith.addf %53, %55 : vector<16x32xf32>
      %c0_27 = arith.constant 0 : index
      %c0_28 = arith.constant 0 : index
      %57 = vector.load %arg9[%c0_27, %c0_28] : memref<8x32xbf16, #tpu.memory_space<vmem>>, vector<8x32xbf16>
      %cst_29 = arith.constant dense<0.000000e+00> : vector<16x32xf32>
      %58 = tpu.matmul %47, %57, %cst_29 {dimension_numbers = #tpu.dot_dimension_numbers<[1], [0], [0], [1], [0, 0, 1, 1], [], []>} : vector<16x8xbf16>, vector<8x32xbf16>, vector<16x32xf32> -> vector<16x32xf32>
      %c0_30 = arith.constant 0 : index
      %c0_31 = arith.constant 0 : index
      %59 = vector.load %arg10[%c0_30, %c0_31] : memref<1x32xf32, #tpu.memory_space<vmem>>, vector<1x32xf32>
      %60 = vector.broadcast %59 : vector<1x32xf32> to vector<16x32xf32>
      %61 = arith.addf %58, %60 : vector<16x32xf32>
      %c0_32 = arith.constant 0 : index
      %c0_33 = arith.constant 0 : index
      %62 = vector.load %arg7[%c0_32, %c0_33] : memref<32x8xbf16, #tpu.memory_space<vmem>>, vector<32x8xbf16>
      %cst_34 = arith.constant dense<0.000000e+00> : vector<32x16xf32>
      %63 = tpu.matmul %62, %49, %cst_34 {dimension_numbers = #tpu.dot_dimension_numbers<[1], [0], [0], [1], [0, 0, 1, 1], [], []>} : vector<32x8xbf16>, vector<8x16xbf16>, vector<32x16xf32> -> vector<32x16xf32>
      %c0_35 = arith.constant 0 : index
      %c0_36 = arith.constant 0 : index
      %64 = vector.load %arg8[%c0_35, %c0_36] : memref<32x1xf32, #tpu.memory_space<vmem>>, vector<32x1xf32>
      %65 = vector.broadcast %64 : vector<32x1xf32> to vector<32x16xf32>
      %66 = arith.addf %63, %65 : vector<32x16xf32>
      %c0_37 = arith.constant 0 : index
      %c0_38 = arith.constant 0 : index
      %67 = vector.load %arg11[%c0_37, %c0_38] : memref<1x32xf32, #tpu.memory_space<vmem>>, vector<1x32xf32>
      %68 = vector.extract_strided_slice %61 {offsets = [0, 0], sizes = [16, 1], strides = [1, 1]} : vector<16x32xf32> to vector<16x1xf32>
      %69 = vector.extract_strided_slice %66 {offsets = [0, 0], sizes = [1, 16], strides = [1, 1]} : vector<32x16xf32> to vector<1x16xf32>
      %70 = vector.broadcast %68 : vector<16x1xf32> to vector<16x16xf32>
      %71 = vector.broadcast %69 : vector<1x16xf32> to vector<16x16xf32>
      %72 = arith.addf %70, %71 : vector<16x16xf32>
      %73 = vector.extract_strided_slice %67 {offsets = [0, 0], sizes = [1, 1], strides = [1, 1]} : vector<1x32xf32> to vector<1x1xf32>
      %cst_39 = arith.constant 2.000000e-01 : f32
      %74 = vector.broadcast %cst_39 : f32 to vector<16x16xf32>
      %75 = arith.mulf %74, %72 : vector<16x16xf32>
      %76 = arith.maximumf %72, %75 : vector<16x16xf32>
      %77 = vector.broadcast %73 : vector<1x1xf32> to vector<16x16xf32>
      %78 = arith.mulf %77, %76 : vector<16x16xf32>
      %79 = arith.addf %51, %78 : vector<16x16xf32>
      %80 = vector.extract_strided_slice %61 {offsets = [0, 1], sizes = [16, 1], strides = [1, 1]} : vector<16x32xf32> to vector<16x1xf32>
      %81 = vector.extract_strided_slice %66 {offsets = [1, 0], sizes = [1, 16], strides = [1, 1]} : vector<32x16xf32> to vector<1x16xf32>
      %82 = vector.broadcast %80 : vector<16x1xf32> to vector<16x16xf32>
      %83 = vector.broadcast %81 : vector<1x16xf32> to vector<16x16xf32>
      %84 = arith.addf %82, %83 : vector<16x16xf32>
      %85 = vector.extract_strided_slice %67 {offsets = [0, 1], sizes = [1, 1], strides = [1, 1]} : vector<1x32xf32> to vector<1x1xf32>
      %cst_40 = arith.constant 2.000000e-01 : f32
      %86 = vector.broadcast %cst_40 : f32 to vector<16x16xf32>
      %87 = arith.mulf %86, %84 : vector<16x16xf32>
      %88 = arith.maximumf %84, %87 : vector<16x16xf32>
      %89 = vector.broadcast %85 : vector<1x1xf32> to vector<16x16xf32>
      %90 = arith.mulf %89, %88 : vector<16x16xf32>
      %91 = arith.addf %79, %90 : vector<16x16xf32>
      %92 = vector.extract_strided_slice %61 {offsets = [0, 2], sizes = [16, 1], strides = [1, 1]} : vector<16x32xf32> to vector<16x1xf32>
      %93 = vector.extract_strided_slice %66 {offsets = [2, 0], sizes = [1, 16], strides = [1, 1]} : vector<32x16xf32> to vector<1x16xf32>
      %94 = vector.broadcast %92 : vector<16x1xf32> to vector<16x16xf32>
      %95 = vector.broadcast %93 : vector<1x16xf32> to vector<16x16xf32>
      %96 = arith.addf %94, %95 : vector<16x16xf32>
      %97 = vector.extract_strided_slice %67 {offsets = [0, 2], sizes = [1, 1], strides = [1, 1]} : vector<1x32xf32> to vector<1x1xf32>
      %cst_41 = arith.constant 2.000000e-01 : f32
      %98 = vector.broadcast %cst_41 : f32 to vector<16x16xf32>
      %99 = arith.mulf %98, %96 : vector<16x16xf32>
      %100 = arith.maximumf %96, %99 : vector<16x16xf32>
      %101 = vector.broadcast %97 : vector<1x1xf32> to vector<16x16xf32>
      %102 = arith.mulf %101, %100 : vector<16x16xf32>
      %103 = arith.addf %91, %102 : vector<16x16xf32>
      %104 = vector.extract_strided_slice %61 {offsets = [0, 3], sizes = [16, 1], strides = [1, 1]} : vector<16x32xf32> to vector<16x1xf32>
      %105 = vector.extract_strided_slice %66 {offsets = [3, 0], sizes = [1, 16], strides = [1, 1]} : vector<32x16xf32> to vector<1x16xf32>
      %106 = vector.broadcast %104 : vector<16x1xf32> to vector<16x16xf32>
      %107 = vector.broadcast %105 : vector<1x16xf32> to vector<16x16xf32>
      %108 = arith.addf %106, %107 : vector<16x16xf32>
      %109 = vector.extract_strided_slice %67 {offsets = [0, 3], sizes = [1, 1], strides = [1, 1]} : vector<1x32xf32> to vector<1x1xf32>
      %cst_42 = arith.constant 2.000000e-01 : f32
      %110 = vector.broadcast %cst_42 : f32 to vector<16x16xf32>
      %111 = arith.mulf %110, %108 : vector<16x16xf32>
      %112 = arith.maximumf %108, %111 : vector<16x16xf32>
      %113 = vector.broadcast %109 : vector<1x1xf32> to vector<16x16xf32>
      %114 = arith.mulf %113, %112 : vector<16x16xf32>
      %115 = arith.addf %103, %114 : vector<16x16xf32>
      %116 = vector.extract_strided_slice %61 {offsets = [0, 4], sizes = [16, 1], strides = [1, 1]} : vector<16x32xf32> to vector<16x1xf32>
      %117 = vector.extract_strided_slice %66 {offsets = [4, 0], sizes = [1, 16], strides = [1, 1]} : vector<32x16xf32> to vector<1x16xf32>
      %118 = vector.broadcast %116 : vector<16x1xf32> to vector<16x16xf32>
      %119 = vector.broadcast %117 : vector<1x16xf32> to vector<16x16xf32>
      %120 = arith.addf %118, %119 : vector<16x16xf32>
      %121 = vector.extract_strided_slice %67 {offsets = [0, 4], sizes = [1, 1], strides = [1, 1]} : vector<1x32xf32> to vector<1x1xf32>
      %cst_43 = arith.constant 2.000000e-01 : f32
      %122 = vector.broadcast %cst_43 : f32 to vector<16x16xf32>
      %123 = arith.mulf %122, %120 : vector<16x16xf32>
      %124 = arith.maximumf %120, %123 : vector<16x16xf32>
      %125 = vector.broadcast %121 : vector<1x1xf32> to vector<16x16xf32>
      %126 = arith.mulf %125, %124 : vector<16x16xf32>
      %127 = arith.addf %115, %126 : vector<16x16xf32>
      %128 = vector.extract_strided_slice %61 {offsets = [0, 5], sizes = [16, 1], strides = [1, 1]} : vector<16x32xf32> to vector<16x1xf32>
      %129 = vector.extract_strided_slice %66 {offsets = [5, 0], sizes = [1, 16], strides = [1, 1]} : vector<32x16xf32> to vector<1x16xf32>
      %130 = vector.broadcast %128 : vector<16x1xf32> to vector<16x16xf32>
      %131 = vector.broadcast %129 : vector<1x16xf32> to vector<16x16xf32>
      %132 = arith.addf %130, %131 : vector<16x16xf32>
      %133 = vector.extract_strided_slice %67 {offsets = [0, 5], sizes = [1, 1], strides = [1, 1]} : vector<1x32xf32> to vector<1x1xf32>
      %cst_44 = arith.constant 2.000000e-01 : f32
      %134 = vector.broadcast %cst_44 : f32 to vector<16x16xf32>
      %135 = arith.mulf %134, %132 : vector<16x16xf32>
      %136 = arith.maximumf %132, %135 : vector<16x16xf32>
      %137 = vector.broadcast %133 : vector<1x1xf32> to vector<16x16xf32>
      %138 = arith.mulf %137, %136 : vector<16x16xf32>
      %139 = arith.addf %127, %138 : vector<16x16xf32>
      %140 = vector.extract_strided_slice %61 {offsets = [0, 6], sizes = [16, 1], strides = [1, 1]} : vector<16x32xf32> to vector<16x1xf32>
      %141 = vector.extract_strided_slice %66 {offsets = [6, 0], sizes = [1, 16], strides = [1, 1]} : vector<32x16xf32> to vector<1x16xf32>
      %142 = vector.broadcast %140 : vector<16x1xf32> to vector<16x16xf32>
      %143 = vector.broadcast %141 : vector<1x16xf32> to vector<16x16xf32>
      %144 = arith.addf %142, %143 : vector<16x16xf32>
      %145 = vector.extract_strided_slice %67 {offsets = [0, 6], sizes = [1, 1], strides = [1, 1]} : vector<1x32xf32> to vector<1x1xf32>
      %cst_45 = arith.constant 2.000000e-01 : f32
      %146 = vector.broadcast %cst_45 : f32 to vector<16x16xf32>
      %147 = arith.mulf %146, %144 : vector<16x16xf32>
      %148 = arith.maximumf %144, %147 : vector<16x16xf32>
      %149 = vector.broadcast %145 : vector<1x1xf32> to vector<16x16xf32>
      %150 = arith.mulf %149, %148 : vector<16x16xf32>
      %151 = arith.addf %139, %150 : vector<16x16xf32>
      %152 = vector.extract_strided_slice %61 {offsets = [0, 7], sizes = [16, 1], strides = [1, 1]} : vector<16x32xf32> to vector<16x1xf32>
      %153 = vector.extract_strided_slice %66 {offsets = [7, 0], sizes = [1, 16], strides = [1, 1]} : vector<32x16xf32> to vector<1x16xf32>
      %154 = vector.broadcast %152 : vector<16x1xf32> to vector<16x16xf32>
      %155 = vector.broadcast %153 : vector<1x16xf32> to vector<16x16xf32>
      %156 = arith.addf %154, %155 : vector<16x16xf32>
      %157 = vector.extract_strided_slice %67 {offsets = [0, 7], sizes = [1, 1], strides = [1, 1]} : vector<1x32xf32> to vector<1x1xf32>
      %cst_46 = arith.constant 2.000000e-01 : f32
      %158 = vector.broadcast %cst_46 : f32 to vector<16x16xf32>
      %159 = arith.mulf %158, %156 : vector<16x16xf32>
      %160 = arith.maximumf %156, %159 : vector<16x16xf32>
      %161 = vector.broadcast %157 : vector<1x1xf32> to vector<16x16xf32>
      %162 = arith.mulf %161, %160 : vector<16x16xf32>
      %163 = arith.addf %151, %162 : vector<16x16xf32>
      %164 = vector.extract_strided_slice %61 {offsets = [0, 8], sizes = [16, 1], strides = [1, 1]} : vector<16x32xf32> to vector<16x1xf32>
      %165 = vector.extract_strided_slice %66 {offsets = [8, 0], sizes = [1, 16], strides = [1, 1]} : vector<32x16xf32> to vector<1x16xf32>
      %166 = vector.broadcast %164 : vector<16x1xf32> to vector<16x16xf32>
      %167 = vector.broadcast %165 : vector<1x16xf32> to vector<16x16xf32>
      %168 = arith.addf %166, %167 : vector<16x16xf32>
      %169 = vector.extract_strided_slice %67 {offsets = [0, 8], sizes = [1, 1], strides = [1, 1]} : vector<1x32xf32> to vector<1x1xf32>
      %cst_47 = arith.constant 2.000000e-01 : f32
      %170 = vector.broadcast %cst_47 : f32 to vector<16x16xf32>
      %171 = arith.mulf %170, %168 : vector<16x16xf32>
      %172 = arith.maximumf %168, %171 : vector<16x16xf32>
      %173 = vector.broadcast %169 : vector<1x1xf32> to vector<16x16xf32>
      %174 = arith.mulf %173, %172 : vector<16x16xf32>
      %175 = arith.addf %163, %174 : vector<16x16xf32>
      %176 = vector.extract_strided_slice %61 {offsets = [0, 9], sizes = [16, 1], strides = [1, 1]} : vector<16x32xf32> to vector<16x1xf32>
      %177 = vector.extract_strided_slice %66 {offsets = [9, 0], sizes = [1, 16], strides = [1, 1]} : vector<32x16xf32> to vector<1x16xf32>
      %178 = vector.broadcast %176 : vector<16x1xf32> to vector<16x16xf32>
      %179 = vector.broadcast %177 : vector<1x16xf32> to vector<16x16xf32>
      %180 = arith.addf %178, %179 : vector<16x16xf32>
      %181 = vector.extract_strided_slice %67 {offsets = [0, 9], sizes = [1, 1], strides = [1, 1]} : vector<1x32xf32> to vector<1x1xf32>
      %cst_48 = arith.constant 2.000000e-01 : f32
      %182 = vector.broadcast %cst_48 : f32 to vector<16x16xf32>
      %183 = arith.mulf %182, %180 : vector<16x16xf32>
      %184 = arith.maximumf %180, %183 : vector<16x16xf32>
      %185 = vector.broadcast %181 : vector<1x1xf32> to vector<16x16xf32>
      %186 = arith.mulf %185, %184 : vector<16x16xf32>
      %187 = arith.addf %175, %186 : vector<16x16xf32>
      %188 = vector.extract_strided_slice %61 {offsets = [0, 10], sizes = [16, 1], strides = [1, 1]} : vector<16x32xf32> to vector<16x1xf32>
      %189 = vector.extract_strided_slice %66 {offsets = [10, 0], sizes = [1, 16], strides = [1, 1]} : vector<32x16xf32> to vector<1x16xf32>
      %190 = vector.broadcast %188 : vector<16x1xf32> to vector<16x16xf32>
      %191 = vector.broadcast %189 : vector<1x16xf32> to vector<16x16xf32>
      %192 = arith.addf %190, %191 : vector<16x16xf32>
      %193 = vector.extract_strided_slice %67 {offsets = [0, 10], sizes = [1, 1], strides = [1, 1]} : vector<1x32xf32> to vector<1x1xf32>
      %cst_49 = arith.constant 2.000000e-01 : f32
      %194 = vector.broadcast %cst_49 : f32 to vector<16x16xf32>
      %195 = arith.mulf %194, %192 : vector<16x16xf32>
      %196 = arith.maximumf %192, %195 : vector<16x16xf32>
      %197 = vector.broadcast %193 : vector<1x1xf32> to vector<16x16xf32>
      %198 = arith.mulf %197, %196 : vector<16x16xf32>
      %199 = arith.addf %187, %198 : vector<16x16xf32>
      %200 = vector.extract_strided_slice %61 {offsets = [0, 11], sizes = [16, 1], strides = [1, 1]} : vector<16x32xf32> to vector<16x1xf32>
      %201 = vector.extract_strided_slice %66 {offsets = [11, 0], sizes = [1, 16], strides = [1, 1]} : vector<32x16xf32> to vector<1x16xf32>
      %202 = vector.broadcast %200 : vector<16x1xf32> to vector<16x16xf32>
      %203 = vector.broadcast %201 : vector<1x16xf32> to vector<16x16xf32>
      %204 = arith.addf %202, %203 : vector<16x16xf32>
      %205 = vector.extract_strided_slice %67 {offsets = [0, 11], sizes = [1, 1], strides = [1, 1]} : vector<1x32xf32> to vector<1x1xf32>
      %cst_50 = arith.constant 2.000000e-01 : f32
      %206 = vector.broadcast %cst_50 : f32 to vector<16x16xf32>
      %207 = arith.mulf %206, %204 : vector<16x16xf32>
      %208 = arith.maximumf %204, %207 : vector<16x16xf32>
      %209 = vector.broadcast %205 : vector<1x1xf32> to vector<16x16xf32>
      %210 = arith.mulf %209, %208 : vector<16x16xf32>
      %211 = arith.addf %199, %210 : vector<16x16xf32>
      %212 = vector.extract_strided_slice %61 {offsets = [0, 12], sizes = [16, 1], strides = [1, 1]} : vector<16x32xf32> to vector<16x1xf32>
      %213 = vector.extract_strided_slice %66 {offsets = [12, 0], sizes = [1, 16], strides = [1, 1]} : vector<32x16xf32> to vector<1x16xf32>
      %214 = vector.broadcast %212 : vector<16x1xf32> to vector<16x16xf32>
      %215 = vector.broadcast %213 : vector<1x16xf32> to vector<16x16xf32>
      %216 = arith.addf %214, %215 : vector<16x16xf32>
      %217 = vector.extract_strided_slice %67 {offsets = [0, 12], sizes = [1, 1], strides = [1, 1]} : vector<1x32xf32> to vector<1x1xf32>
      %cst_51 = arith.constant 2.000000e-01 : f32
      %218 = vector.broadcast %cst_51 : f32 to vector<16x16xf32>
      %219 = arith.mulf %218, %216 : vector<16x16xf32>
      %220 = arith.maximumf %216, %219 : vector<16x16xf32>
      %221 = vector.broadcast %217 : vector<1x1xf32> to vector<16x16xf32>
      %222 = arith.mulf %221, %220 : vector<16x16xf32>
      %223 = arith.addf %211, %222 : vector<16x16xf32>
      %224 = vector.extract_strided_slice %61 {offsets = [0, 13], sizes = [16, 1], strides = [1, 1]} : vector<16x32xf32> to vector<16x1xf32>
      %225 = vector.extract_strided_slice %66 {offsets = [13, 0], sizes = [1, 16], strides = [1, 1]} : vector<32x16xf32> to vector<1x16xf32>
      %226 = vector.broadcast %224 : vector<16x1xf32> to vector<16x16xf32>
      %227 = vector.broadcast %225 : vector<1x16xf32> to vector<16x16xf32>
      %228 = arith.addf %226, %227 : vector<16x16xf32>
      %229 = vector.extract_strided_slice %67 {offsets = [0, 13], sizes = [1, 1], strides = [1, 1]} : vector<1x32xf32> to vector<1x1xf32>
      %cst_52 = arith.constant 2.000000e-01 : f32
      %230 = vector.broadcast %cst_52 : f32 to vector<16x16xf32>
      %231 = arith.mulf %230, %228 : vector<16x16xf32>
      %232 = arith.maximumf %228, %231 : vector<16x16xf32>
      %233 = vector.broadcast %229 : vector<1x1xf32> to vector<16x16xf32>
      %234 = arith.mulf %233, %232 : vector<16x16xf32>
      %235 = arith.addf %223, %234 : vector<16x16xf32>
      %236 = vector.extract_strided_slice %61 {offsets = [0, 14], sizes = [16, 1], strides = [1, 1]} : vector<16x32xf32> to vector<16x1xf32>
      %237 = vector.extract_strided_slice %66 {offsets = [14, 0], sizes = [1, 16], strides = [1, 1]} : vector<32x16xf32> to vector<1x16xf32>
      %238 = vector.broadcast %236 : vector<16x1xf32> to vector<16x16xf32>
      %239 = vector.broadcast %237 : vector<1x16xf32> to vector<16x16xf32>
      %240 = arith.addf %238, %239 : vector<16x16xf32>
      %241 = vector.extract_strided_slice %67 {offsets = [0, 14], sizes = [1, 1], strides = [1, 1]} : vector<1x32xf32> to vector<1x1xf32>
      %cst_53 = arith.constant 2.000000e-01 : f32
      %242 = vector.broadcast %cst_53 : f32 to vector<16x16xf32>
      %243 = arith.mulf %242, %240 : vector<16x16xf32>
      %244 = arith.maximumf %240, %243 : vector<16x16xf32>
      %245 = vector.broadcast %241 : vector<1x1xf32> to vector<16x16xf32>
      %246 = arith.mulf %245, %244 : vector<16x16xf32>
      %247 = arith.addf %235, %246 : vector<16x16xf32>
      %248 = vector.extract_strided_slice %61 {offsets = [0, 15], sizes = [16, 1], strides = [1, 1]} : vector<16x32xf32> to vector<16x1xf32>
      %249 = vector.extract_strided_slice %66 {offsets = [15, 0], sizes = [1, 16], strides = [1, 1]} : vector<32x16xf32> to vector<1x16xf32>
      %250 = vector.broadcast %248 : vector<16x1xf32> to vector<16x16xf32>
      %251 = vector.broadcast %249 : vector<1x16xf32> to vector<16x16xf32>
      %252 = arith.addf %250, %251 : vector<16x16xf32>
      %253 = vector.extract_strided_slice %67 {offsets = [0, 15], sizes = [1, 1], strides = [1, 1]} : vector<1x32xf32> to vector<1x1xf32>
      %cst_54 = arith.constant 2.000000e-01 : f32
      %254 = vector.broadcast %cst_54 : f32 to vector<16x16xf32>
      %255 = arith.mulf %254, %252 : vector<16x16xf32>
      %256 = arith.maximumf %252, %255 : vector<16x16xf32>
      %257 = vector.broadcast %253 : vector<1x1xf32> to vector<16x16xf32>
      %258 = arith.mulf %257, %256 : vector<16x16xf32>
      %259 = arith.addf %247, %258 : vector<16x16xf32>
      %260 = vector.extract_strided_slice %61 {offsets = [0, 16], sizes = [16, 1], strides = [1, 1]} : vector<16x32xf32> to vector<16x1xf32>
      %261 = vector.extract_strided_slice %66 {offsets = [16, 0], sizes = [1, 16], strides = [1, 1]} : vector<32x16xf32> to vector<1x16xf32>
      %262 = vector.broadcast %260 : vector<16x1xf32> to vector<16x16xf32>
      %263 = vector.broadcast %261 : vector<1x16xf32> to vector<16x16xf32>
      %264 = arith.addf %262, %263 : vector<16x16xf32>
      %265 = vector.extract_strided_slice %67 {offsets = [0, 16], sizes = [1, 1], strides = [1, 1]} : vector<1x32xf32> to vector<1x1xf32>
      %cst_55 = arith.constant 2.000000e-01 : f32
      %266 = vector.broadcast %cst_55 : f32 to vector<16x16xf32>
      %267 = arith.mulf %266, %264 : vector<16x16xf32>
      %268 = arith.maximumf %264, %267 : vector<16x16xf32>
      %269 = vector.broadcast %265 : vector<1x1xf32> to vector<16x16xf32>
      %270 = arith.mulf %269, %268 : vector<16x16xf32>
      %271 = arith.addf %259, %270 : vector<16x16xf32>
      %272 = vector.extract_strided_slice %61 {offsets = [0, 17], sizes = [16, 1], strides = [1, 1]} : vector<16x32xf32> to vector<16x1xf32>
      %273 = vector.extract_strided_slice %66 {offsets = [17, 0], sizes = [1, 16], strides = [1, 1]} : vector<32x16xf32> to vector<1x16xf32>
      %274 = vector.broadcast %272 : vector<16x1xf32> to vector<16x16xf32>
      %275 = vector.broadcast %273 : vector<1x16xf32> to vector<16x16xf32>
      %276 = arith.addf %274, %275 : vector<16x16xf32>
      %277 = vector.extract_strided_slice %67 {offsets = [0, 17], sizes = [1, 1], strides = [1, 1]} : vector<1x32xf32> to vector<1x1xf32>
      %cst_56 = arith.constant 2.000000e-01 : f32
      %278 = vector.broadcast %cst_56 : f32 to vector<16x16xf32>
      %279 = arith.mulf %278, %276 : vector<16x16xf32>
      %280 = arith.maximumf %276, %279 : vector<16x16xf32>
      %281 = vector.broadcast %277 : vector<1x1xf32> to vector<16x16xf32>
      %282 = arith.mulf %281, %280 : vector<16x16xf32>
      %283 = arith.addf %271, %282 : vector<16x16xf32>
      %284 = vector.extract_strided_slice %61 {offsets = [0, 18], sizes = [16, 1], strides = [1, 1]} : vector<16x32xf32> to vector<16x1xf32>
      %285 = vector.extract_strided_slice %66 {offsets = [18, 0], sizes = [1, 16], strides = [1, 1]} : vector<32x16xf32> to vector<1x16xf32>
      %286 = vector.broadcast %284 : vector<16x1xf32> to vector<16x16xf32>
      %287 = vector.broadcast %285 : vector<1x16xf32> to vector<16x16xf32>
      %288 = arith.addf %286, %287 : vector<16x16xf32>
      %289 = vector.extract_strided_slice %67 {offsets = [0, 18], sizes = [1, 1], strides = [1, 1]} : vector<1x32xf32> to vector<1x1xf32>
      %cst_57 = arith.constant 2.000000e-01 : f32
      %290 = vector.broadcast %cst_57 : f32 to vector<16x16xf32>
      %291 = arith.mulf %290, %288 : vector<16x16xf32>
      %292 = arith.maximumf %288, %291 : vector<16x16xf32>
      %293 = vector.broadcast %289 : vector<1x1xf32> to vector<16x16xf32>
      %294 = arith.mulf %293, %292 : vector<16x16xf32>
      %295 = arith.addf %283, %294 : vector<16x16xf32>
      %296 = vector.extract_strided_slice %61 {offsets = [0, 19], sizes = [16, 1], strides = [1, 1]} : vector<16x32xf32> to vector<16x1xf32>
      %297 = vector.extract_strided_slice %66 {offsets = [19, 0], sizes = [1, 16], strides = [1, 1]} : vector<32x16xf32> to vector<1x16xf32>
      %298 = vector.broadcast %296 : vector<16x1xf32> to vector<16x16xf32>
      %299 = vector.broadcast %297 : vector<1x16xf32> to vector<16x16xf32>
      %300 = arith.addf %298, %299 : vector<16x16xf32>
      %301 = vector.extract_strided_slice %67 {offsets = [0, 19], sizes = [1, 1], strides = [1, 1]} : vector<1x32xf32> to vector<1x1xf32>
      %cst_58 = arith.constant 2.000000e-01 : f32
      %302 = vector.broadcast %cst_58 : f32 to vector<16x16xf32>
      %303 = arith.mulf %302, %300 : vector<16x16xf32>
      %304 = arith.maximumf %300, %303 : vector<16x16xf32>
      %305 = vector.broadcast %301 : vector<1x1xf32> to vector<16x16xf32>
      %306 = arith.mulf %305, %304 : vector<16x16xf32>
      %307 = arith.addf %295, %306 : vector<16x16xf32>
      %308 = vector.extract_strided_slice %61 {offsets = [0, 20], sizes = [16, 1], strides = [1, 1]} : vector<16x32xf32> to vector<16x1xf32>
      %309 = vector.extract_strided_slice %66 {offsets = [20, 0], sizes = [1, 16], strides = [1, 1]} : vector<32x16xf32> to vector<1x16xf32>
      %310 = vector.broadcast %308 : vector<16x1xf32> to vector<16x16xf32>
      %311 = vector.broadcast %309 : vector<1x16xf32> to vector<16x16xf32>
      %312 = arith.addf %310, %311 : vector<16x16xf32>
      %313 = vector.extract_strided_slice %67 {offsets = [0, 20], sizes = [1, 1], strides = [1, 1]} : vector<1x32xf32> to vector<1x1xf32>
      %cst_59 = arith.constant 2.000000e-01 : f32
      %314 = vector.broadcast %cst_59 : f32 to vector<16x16xf32>
      %315 = arith.mulf %314, %312 : vector<16x16xf32>
      %316 = arith.maximumf %312, %315 : vector<16x16xf32>
      %317 = vector.broadcast %313 : vector<1x1xf32> to vector<16x16xf32>
      %318 = arith.mulf %317, %316 : vector<16x16xf32>
      %319 = arith.addf %307, %318 : vector<16x16xf32>
      %320 = vector.extract_strided_slice %61 {offsets = [0, 21], sizes = [16, 1], strides = [1, 1]} : vector<16x32xf32> to vector<16x1xf32>
      %321 = vector.extract_strided_slice %66 {offsets = [21, 0], sizes = [1, 16], strides = [1, 1]} : vector<32x16xf32> to vector<1x16xf32>
      %322 = vector.broadcast %320 : vector<16x1xf32> to vector<16x16xf32>
      %323 = vector.broadcast %321 : vector<1x16xf32> to vector<16x16xf32>
      %324 = arith.addf %322, %323 : vector<16x16xf32>
      %325 = vector.extract_strided_slice %67 {offsets = [0, 21], sizes = [1, 1], strides = [1, 1]} : vector<1x32xf32> to vector<1x1xf32>
      %cst_60 = arith.constant 2.000000e-01 : f32
      %326 = vector.broadcast %cst_60 : f32 to vector<16x16xf32>
      %327 = arith.mulf %326, %324 : vector<16x16xf32>
      %328 = arith.maximumf %324, %327 : vector<16x16xf32>
      %329 = vector.broadcast %325 : vector<1x1xf32> to vector<16x16xf32>
      %330 = arith.mulf %329, %328 : vector<16x16xf32>
      %331 = arith.addf %319, %330 : vector<16x16xf32>
      %332 = vector.extract_strided_slice %61 {offsets = [0, 22], sizes = [16, 1], strides = [1, 1]} : vector<16x32xf32> to vector<16x1xf32>
      %333 = vector.extract_strided_slice %66 {offsets = [22, 0], sizes = [1, 16], strides = [1, 1]} : vector<32x16xf32> to vector<1x16xf32>
      %334 = vector.broadcast %332 : vector<16x1xf32> to vector<16x16xf32>
      %335 = vector.broadcast %333 : vector<1x16xf32> to vector<16x16xf32>
      %336 = arith.addf %334, %335 : vector<16x16xf32>
      %337 = vector.extract_strided_slice %67 {offsets = [0, 22], sizes = [1, 1], strides = [1, 1]} : vector<1x32xf32> to vector<1x1xf32>
      %cst_61 = arith.constant 2.000000e-01 : f32
      %338 = vector.broadcast %cst_61 : f32 to vector<16x16xf32>
      %339 = arith.mulf %338, %336 : vector<16x16xf32>
      %340 = arith.maximumf %336, %339 : vector<16x16xf32>
      %341 = vector.broadcast %337 : vector<1x1xf32> to vector<16x16xf32>
      %342 = arith.mulf %341, %340 : vector<16x16xf32>
      %343 = arith.addf %331, %342 : vector<16x16xf32>
      %344 = vector.extract_strided_slice %61 {offsets = [0, 23], sizes = [16, 1], strides = [1, 1]} : vector<16x32xf32> to vector<16x1xf32>
      %345 = vector.extract_strided_slice %66 {offsets = [23, 0], sizes = [1, 16], strides = [1, 1]} : vector<32x16xf32> to vector<1x16xf32>
      %346 = vector.broadcast %344 : vector<16x1xf32> to vector<16x16xf32>
      %347 = vector.broadcast %345 : vector<1x16xf32> to vector<16x16xf32>
      %348 = arith.addf %346, %347 : vector<16x16xf32>
      %349 = vector.extract_strided_slice %67 {offsets = [0, 23], sizes = [1, 1], strides = [1, 1]} : vector<1x32xf32> to vector<1x1xf32>
      %cst_62 = arith.constant 2.000000e-01 : f32
      %350 = vector.broadcast %cst_62 : f32 to vector<16x16xf32>
      %351 = arith.mulf %350, %348 : vector<16x16xf32>
      %352 = arith.maximumf %348, %351 : vector<16x16xf32>
      %353 = vector.broadcast %349 : vector<1x1xf32> to vector<16x16xf32>
      %354 = arith.mulf %353, %352 : vector<16x16xf32>
      %355 = arith.addf %343, %354 : vector<16x16xf32>
      %356 = vector.extract_strided_slice %61 {offsets = [0, 24], sizes = [16, 1], strides = [1, 1]} : vector<16x32xf32> to vector<16x1xf32>
      %357 = vector.extract_strided_slice %66 {offsets = [24, 0], sizes = [1, 16], strides = [1, 1]} : vector<32x16xf32> to vector<1x16xf32>
      %358 = vector.broadcast %356 : vector<16x1xf32> to vector<16x16xf32>
      %359 = vector.broadcast %357 : vector<1x16xf32> to vector<16x16xf32>
      %360 = arith.addf %358, %359 : vector<16x16xf32>
      %361 = vector.extract_strided_slice %67 {offsets = [0, 24], sizes = [1, 1], strides = [1, 1]} : vector<1x32xf32> to vector<1x1xf32>
      %cst_63 = arith.constant 2.000000e-01 : f32
      %362 = vector.broadcast %cst_63 : f32 to vector<16x16xf32>
      %363 = arith.mulf %362, %360 : vector<16x16xf32>
      %364 = arith.maximumf %360, %363 : vector<16x16xf32>
      %365 = vector.broadcast %361 : vector<1x1xf32> to vector<16x16xf32>
      %366 = arith.mulf %365, %364 : vector<16x16xf32>
      %367 = arith.addf %355, %366 : vector<16x16xf32>
      %368 = vector.extract_strided_slice %61 {offsets = [0, 25], sizes = [16, 1], strides = [1, 1]} : vector<16x32xf32> to vector<16x1xf32>
      %369 = vector.extract_strided_slice %66 {offsets = [25, 0], sizes = [1, 16], strides = [1, 1]} : vector<32x16xf32> to vector<1x16xf32>
      %370 = vector.broadcast %368 : vector<16x1xf32> to vector<16x16xf32>
      %371 = vector.broadcast %369 : vector<1x16xf32> to vector<16x16xf32>
      %372 = arith.addf %370, %371 : vector<16x16xf32>
      %373 = vector.extract_strided_slice %67 {offsets = [0, 25], sizes = [1, 1], strides = [1, 1]} : vector<1x32xf32> to vector<1x1xf32>
      %cst_64 = arith.constant 2.000000e-01 : f32
      %374 = vector.broadcast %cst_64 : f32 to vector<16x16xf32>
      %375 = arith.mulf %374, %372 : vector<16x16xf32>
      %376 = arith.maximumf %372, %375 : vector<16x16xf32>
      %377 = vector.broadcast %373 : vector<1x1xf32> to vector<16x16xf32>
      %378 = arith.mulf %377, %376 : vector<16x16xf32>
      %379 = arith.addf %367, %378 : vector<16x16xf32>
      %380 = vector.extract_strided_slice %61 {offsets = [0, 26], sizes = [16, 1], strides = [1, 1]} : vector<16x32xf32> to vector<16x1xf32>
      %381 = vector.extract_strided_slice %66 {offsets = [26, 0], sizes = [1, 16], strides = [1, 1]} : vector<32x16xf32> to vector<1x16xf32>
      %382 = vector.broadcast %380 : vector<16x1xf32> to vector<16x16xf32>
      %383 = vector.broadcast %381 : vector<1x16xf32> to vector<16x16xf32>
      %384 = arith.addf %382, %383 : vector<16x16xf32>
      %385 = vector.extract_strided_slice %67 {offsets = [0, 26], sizes = [1, 1], strides = [1, 1]} : vector<1x32xf32> to vector<1x1xf32>
      %cst_65 = arith.constant 2.000000e-01 : f32
      %386 = vector.broadcast %cst_65 : f32 to vector<16x16xf32>
      %387 = arith.mulf %386, %384 : vector<16x16xf32>
      %388 = arith.maximumf %384, %387 : vector<16x16xf32>
      %389 = vector.broadcast %385 : vector<1x1xf32> to vector<16x16xf32>
      %390 = arith.mulf %389, %388 : vector<16x16xf32>
      %391 = arith.addf %379, %390 : vector<16x16xf32>
      %392 = vector.extract_strided_slice %61 {offsets = [0, 27], sizes = [16, 1], strides = [1, 1]} : vector<16x32xf32> to vector<16x1xf32>
      %393 = vector.extract_strided_slice %66 {offsets = [27, 0], sizes = [1, 16], strides = [1, 1]} : vector<32x16xf32> to vector<1x16xf32>
      %394 = vector.broadcast %392 : vector<16x1xf32> to vector<16x16xf32>
      %395 = vector.broadcast %393 : vector<1x16xf32> to vector<16x16xf32>
      %396 = arith.addf %394, %395 : vector<16x16xf32>
      %397 = vector.extract_strided_slice %67 {offsets = [0, 27], sizes = [1, 1], strides = [1, 1]} : vector<1x32xf32> to vector<1x1xf32>
      %cst_66 = arith.constant 2.000000e-01 : f32
      %398 = vector.broadcast %cst_66 : f32 to vector<16x16xf32>
      %399 = arith.mulf %398, %396 : vector<16x16xf32>
      %400 = arith.maximumf %396, %399 : vector<16x16xf32>
      %401 = vector.broadcast %397 : vector<1x1xf32> to vector<16x16xf32>
      %402 = arith.mulf %401, %400 : vector<16x16xf32>
      %403 = arith.addf %391, %402 : vector<16x16xf32>
      %404 = vector.extract_strided_slice %61 {offsets = [0, 28], sizes = [16, 1], strides = [1, 1]} : vector<16x32xf32> to vector<16x1xf32>
      %405 = vector.extract_strided_slice %66 {offsets = [28, 0], sizes = [1, 16], strides = [1, 1]} : vector<32x16xf32> to vector<1x16xf32>
      %406 = vector.broadcast %404 : vector<16x1xf32> to vector<16x16xf32>
      %407 = vector.broadcast %405 : vector<1x16xf32> to vector<16x16xf32>
      %408 = arith.addf %406, %407 : vector<16x16xf32>
      %409 = vector.extract_strided_slice %67 {offsets = [0, 28], sizes = [1, 1], strides = [1, 1]} : vector<1x32xf32> to vector<1x1xf32>
      %cst_67 = arith.constant 2.000000e-01 : f32
      %410 = vector.broadcast %cst_67 : f32 to vector<16x16xf32>
      %411 = arith.mulf %410, %408 : vector<16x16xf32>
      %412 = arith.maximumf %408, %411 : vector<16x16xf32>
      %413 = vector.broadcast %409 : vector<1x1xf32> to vector<16x16xf32>
      %414 = arith.mulf %413, %412 : vector<16x16xf32>
      %415 = arith.addf %403, %414 : vector<16x16xf32>
      %416 = vector.extract_strided_slice %61 {offsets = [0, 29], sizes = [16, 1], strides = [1, 1]} : vector<16x32xf32> to vector<16x1xf32>
      %417 = vector.extract_strided_slice %66 {offsets = [29, 0], sizes = [1, 16], strides = [1, 1]} : vector<32x16xf32> to vector<1x16xf32>
      %418 = vector.broadcast %416 : vector<16x1xf32> to vector<16x16xf32>
      %419 = vector.broadcast %417 : vector<1x16xf32> to vector<16x16xf32>
      %420 = arith.addf %418, %419 : vector<16x16xf32>
      %421 = vector.extract_strided_slice %67 {offsets = [0, 29], sizes = [1, 1], strides = [1, 1]} : vector<1x32xf32> to vector<1x1xf32>
      %cst_68 = arith.constant 2.000000e-01 : f32
      %422 = vector.broadcast %cst_68 : f32 to vector<16x16xf32>
      %423 = arith.mulf %422, %420 : vector<16x16xf32>
      %424 = arith.maximumf %420, %423 : vector<16x16xf32>
      %425 = vector.broadcast %421 : vector<1x1xf32> to vector<16x16xf32>
      %426 = arith.mulf %425, %424 : vector<16x16xf32>
      %427 = arith.addf %415, %426 : vector<16x16xf32>
      %428 = vector.extract_strided_slice %61 {offsets = [0, 30], sizes = [16, 1], strides = [1, 1]} : vector<16x32xf32> to vector<16x1xf32>
      %429 = vector.extract_strided_slice %66 {offsets = [30, 0], sizes = [1, 16], strides = [1, 1]} : vector<32x16xf32> to vector<1x16xf32>
      %430 = vector.broadcast %428 : vector<16x1xf32> to vector<16x16xf32>
      %431 = vector.broadcast %429 : vector<1x16xf32> to vector<16x16xf32>
      %432 = arith.addf %430, %431 : vector<16x16xf32>
      %433 = vector.extract_strided_slice %67 {offsets = [0, 30], sizes = [1, 1], strides = [1, 1]} : vector<1x32xf32> to vector<1x1xf32>
      %cst_69 = arith.constant 2.000000e-01 : f32
      %434 = vector.broadcast %cst_69 : f32 to vector<16x16xf32>
      %435 = arith.mulf %434, %432 : vector<16x16xf32>
      %436 = arith.maximumf %432, %435 : vector<16x16xf32>
      %437 = vector.broadcast %433 : vector<1x1xf32> to vector<16x16xf32>
      %438 = arith.mulf %437, %436 : vector<16x16xf32>
      %439 = arith.addf %427, %438 : vector<16x16xf32>
      %440 = vector.extract_strided_slice %61 {offsets = [0, 31], sizes = [16, 1], strides = [1, 1]} : vector<16x32xf32> to vector<16x1xf32>
      %441 = vector.extract_strided_slice %66 {offsets = [31, 0], sizes = [1, 16], strides = [1, 1]} : vector<32x16xf32> to vector<1x16xf32>
      %442 = vector.broadcast %440 : vector<16x1xf32> to vector<16x16xf32>
      %443 = vector.broadcast %441 : vector<1x16xf32> to vector<16x16xf32>
      %444 = arith.addf %442, %443 : vector<16x16xf32>
      %445 = vector.extract_strided_slice %67 {offsets = [0, 31], sizes = [1, 1], strides = [1, 1]} : vector<1x32xf32> to vector<1x1xf32>
      %cst_70 = arith.constant 2.000000e-01 : f32
      %446 = vector.broadcast %cst_70 : f32 to vector<16x16xf32>
      %447 = arith.mulf %446, %444 : vector<16x16xf32>
      %448 = arith.maximumf %444, %447 : vector<16x16xf32>
      %449 = vector.broadcast %445 : vector<1x1xf32> to vector<16x16xf32>
      %450 = arith.mulf %449, %448 : vector<16x16xf32>
      %451 = arith.addf %439, %450 : vector<16x16xf32>
      %cst_71 = arith.constant dense<0xFF800000> : vector<16xf32>
      %452 = vector.multi_reduction <maximumf>, %451, %cst_71 [1] : vector<16x16xf32> to vector<16xf32>
      %453 = vector.shape_cast %452 : vector<16xf32> to vector<16x1xf32>
      %454 = vector.broadcast %453 : vector<16x1xf32> to vector<16x16xf32>
      %455 = arith.subf %451, %454 : vector<16x16xf32>
      %456 = math.exp %455 : vector<16x16xf32>
      %cst_72 = arith.constant dense<0.000000e+00> : vector<16xf32>
      %457 = vector.multi_reduction <add>, %456, %cst_72 [1] : vector<16x16xf32> to vector<16xf32>
      %458 = vector.shape_cast %457 : vector<16xf32> to vector<16x1xf32>
      %459 = tpu.reciprocal %458 : vector<16x1xf32> -> vector<16x1xf32>
      %460 = vector.broadcast %459 : vector<16x1xf32> to vector<16x16xf32>
      %461 = arith.mulf %456, %460 : vector<16x16xf32>
      %462 = arith.truncf %461 : vector<16x16xf32> to vector<16x16xbf16>
      %463 = arith.truncf %56 : vector<16x32xf32> to vector<16x32xbf16>
      %cst_73 = arith.constant dense<0.000000e+00> : vector<16x32xf32>
      %464 = tpu.matmul %462, %463, %cst_73 {dimension_numbers = #tpu.dot_dimension_numbers<[1], [0], [0], [1], [0, 0, 1, 1], [], []>} : vector<16x16xbf16>, vector<16x32xbf16>, vector<16x32xf32> -> vector<16x32xf32>
      %c0_74 = arith.constant 0 : index
      %c0_75 = arith.constant 0 : index
      %465 = vector.load %arg12[%c0_74, %c0_75] : memref<1x32xf32, #tpu.memory_space<vmem>>, vector<1x32xf32>
      %466 = vector.broadcast %465 : vector<1x32xf32> to vector<16x32xf32>
      %467 = arith.addf %464, %466 : vector<16x32xf32>
      %cst_76 = arith.constant 0.000000e+00 : f32
      %468 = vector.broadcast %cst_76 : f32 to vector<16x32xf32>
      %469 = arith.maximumf %467, %468 : vector<16x32xf32>
      %470 = arith.truncf %469 : vector<16x32xf32> to vector<16x32xbf16>
      %c0_77 = arith.constant 0 : index
      %c0_78 = arith.constant 0 : index
      %471 = vector.load %arg13[%c0_77, %c0_78] : memref<32x128xbf16, #tpu.memory_space<vmem>>, vector<32x128xbf16>
      %cst_79 = arith.constant dense<0.000000e+00> : vector<16x128xf32>
      %472 = tpu.matmul %470, %471, %cst_79 {dimension_numbers = #tpu.dot_dimension_numbers<[1], [0], [0], [1], [0, 0, 1, 1], [], []>} : vector<16x32xbf16>, vector<32x128xbf16>, vector<16x128xf32> -> vector<16x128xf32>
      %c0_80 = arith.constant 0 : index
      %c0_81 = arith.constant 0 : index
      %473 = vector.load %arg14[%c0_80, %c0_81] : memref<1x128xf32, #tpu.memory_space<vmem>>, vector<1x128xf32>
      %474 = vector.broadcast %473 : vector<1x128xf32> to vector<16x128xf32>
      %475 = arith.addf %472, %474 : vector<16x128xf32>
      %c0_82 = arith.constant 0 : index
      %c0_83 = arith.constant 0 : index
      %476 = vector.load %arg22[%c0_82, %c0_83] : memref<16x128xf32, #tpu.memory_space<vmem>>, vector<16x128xf32>
      tpu.vector_store %arg22[%c0_82, %c0_83], %475 {strides = array<i32>} : memref<16x128xf32, #tpu.memory_space<vmem>>, vector<16x128xf32>,
      %c0_84 = arith.constant 0 : index
      %c0_85 = arith.constant 0 : index
      %477 = vector.load %arg17[%c0_84, %c0_85] : memref<32x1xbf16, #tpu.memory_space<vmem>>, vector<32x1xbf16>
      %cst_86 = arith.constant dense<0.000000e+00> : vector<16x1xf32>
      %478 = tpu.matmul %470, %477, %cst_86 {dimension_numbers = #tpu.dot_dimension_numbers<[1], [0], [0], [1], [0, 0, 1, 1], [], []>} : vector<16x32xbf16>, vector<32x1xbf16>, vector<16x1xf32> -> vector<16x1xf32>
      %c0_87 = arith.constant 0 : index
      %c0_88 = arith.constant 0 : index
      %479 = vector.load %arg18[%c0_87, %c0_88] : memref<1x1xf32, #tpu.memory_space<vmem>>, vector<1x1xf32>
      %480 = vector.broadcast %479 : vector<1x1xf32> to vector<16x1xf32>
      %481 = arith.addf %478, %480 : vector<16x1xf32>
      %c0_89 = arith.constant 0 : index
      %c0_90 = arith.constant 0 : index
      %482 = vector.load %arg24[%c0_89, %c0_90] : memref<16x1xf32, #tpu.memory_space<vmem>>, vector<16x1xf32>
      tpu.vector_store %arg24[%c0_89, %c0_90], %481 {strides = array<i32>} : memref<16x1xf32, #tpu.memory_space<vmem>>, vector<16x1xf32>,
      %c0_91 = arith.constant 0 : index
      %c0_92 = arith.constant 0 : index
      %483 = vector.load %arg15[%c0_91, %c0_92] : memref<1x32xbf16, #tpu.memory_space<vmem>>, vector<1x32xbf16>
      %cst_93 = arith.constant dense<0.000000e+00> : vector<1x16xf32>
      %484 = tpu.matmul %483, %470, %cst_93 {dimension_numbers = #tpu.dot_dimension_numbers<[1], [1], [0], [0], [0, 0, 1, 0], [], []>} : vector<1x32xbf16>, vector<16x32xbf16>, vector<1x16xf32> -> vector<1x16xf32>
      %c0_94 = arith.constant 0 : index
      %c0_95 = arith.constant 0 : index
      %485 = vector.load %arg16[%c0_94, %c0_95] : memref<1x1xf32, #tpu.memory_space<vmem>>, vector<1x1xf32>
      %486 = vector.broadcast %485 : vector<1x1xf32> to vector<1x16xf32>
      %487 = arith.addf %484, %486 : vector<1x16xf32>
      %c0_96 = arith.constant 0 : index
      %c0_97 = arith.constant 0 : index
      %488 = vector.load %arg23[%c0_96, %c0_97] : memref<1x16xf32, #tpu.memory_space<vmem>>, vector<1x16xf32>
      tpu.vector_store %arg23[%c0_96, %c0_97], %487 {strides = array<i32>} : memref<1x16xf32, #tpu.memory_space<vmem>>, vector<1x16xf32>,
    } else {
    }
    %c1_i32 = arith.constant 1 : i32
    %3 = arith.muli %arg0, %c1_i32 : i32
    %4 = arith.addi %3, %arg1 : i32
    %c8_i32 = arith.constant 8 : i32
    %5 = arith.muli %4, %c8_i32 : i32
    %6 = tpu.assume_multiple %5, 8 : i32
    %7 = arith.index_cast %6 : i32 to index
    %c0 = arith.constant 0 : index
    %8 = vector.load %arg24[%7, %c0] : memref<16x1xf32, #tpu.memory_space<vmem>>, vector<8x1xf32>
    %c0_1 = arith.constant 0 : index
    %c0_2 = arith.constant 0 : index
    %9 = vector.load %arg23[%c0_1, %c0_2] : memref<1x16xf32, #tpu.memory_space<vmem>>, vector<1x16xf32>
    %c0_3 = arith.constant 0 : index
    %c0_4 = arith.constant 0 : index
    %10 = vector.load %arg19[%c0_3, %c0_4] : memref<1x1xf32, #tpu.memory_space<vmem>>, vector<1x1xf32>
    %11 = arith.index_cast %6 : i32 to index
    %c0_5 = arith.constant 0 : index
    %12 = vector.load %arg4[%11, %c0_5] : memref<16x16xbf16, #tpu.memory_space<vmem>>, vector<8x16xbf16>
    %13 = arith.extf %12 : vector<8x16xbf16> to vector<8x16xf32>
    %14 = vector.broadcast %8 : vector<8x1xf32> to vector<8x16xf32>
    %15 = vector.broadcast %9 : vector<1x16xf32> to vector<8x16xf32>
    %16 = arith.addf %14, %15 : vector<8x16xf32>
    %cst = arith.constant 2.000000e-01 : f32
    %17 = vector.broadcast %cst : f32 to vector<8x16xf32>
    %18 = arith.mulf %17, %16 : vector<8x16xf32>
    %19 = arith.maximumf %16, %18 : vector<8x16xf32>
    %20 = vector.broadcast %10 : vector<1x1xf32> to vector<8x16xf32>
    %21 = arith.mulf %20, %19 : vector<8x16xf32>
    %22 = arith.addf %13, %21 : vector<8x16xf32>
    %cst_6 = arith.constant dense<0xFF800000> : vector<8xf32>
    %23 = vector.multi_reduction <maximumf>, %22, %cst_6 [1] : vector<8x16xf32> to vector<8xf32>
    %24 = vector.shape_cast %23 : vector<8xf32> to vector<8x1xf32>
    %25 = vector.broadcast %24 : vector<8x1xf32> to vector<8x16xf32>
    %26 = arith.subf %22, %25 : vector<8x16xf32>
    %27 = math.exp %26 : vector<8x16xf32>
    %cst_7 = arith.constant dense<0.000000e+00> : vector<8xf32>
    %28 = vector.multi_reduction <add>, %27, %cst_7 [1] : vector<8x16xf32> to vector<8xf32>
    %29 = vector.shape_cast %28 : vector<8xf32> to vector<8x1xf32>
    %30 = tpu.reciprocal %29 : vector<8x1xf32> -> vector<8x1xf32>
    %31 = vector.broadcast %30 : vector<8x1xf32> to vector<8x16xf32>
    %32 = arith.mulf %27, %31 : vector<8x16xf32>
    %33 = arith.truncf %32 : vector<8x16xf32> to vector<8x16xbf16>
    %c0_8 = arith.constant 0 : index
    %c0_9 = arith.constant 0 : index
    %34 = vector.load %arg22[%c0_8, %c0_9] : memref<16x128xf32, #tpu.memory_space<vmem>>, vector<16x128xf32>
    %35 = arith.truncf %34 : vector<16x128xf32> to vector<16x128xbf16>
    %cst_10 = arith.constant dense<0.000000e+00> : vector<8x128xf32>
    %36 = tpu.matmul %33, %35, %cst_10 {dimension_numbers = #tpu.dot_dimension_numbers<[1], [0], [0], [1], [0, 0, 1, 1], [], []>} : vector<8x16xbf16>, vector<16x128xbf16>, vector<8x128xf32> -> vector<8x128xf32>
    %c0_11 = arith.constant 0 : index
    %c0_12 = arith.constant 0 : index
    %37 = vector.load %arg20[%c0_11, %c0_12] : memref<1x128xf32, #tpu.memory_space<vmem>>, vector<1x128xf32>
    %38 = vector.broadcast %37 : vector<1x128xf32> to vector<8x128xf32>
    %39 = arith.addf %36, %38 : vector<8x128xf32>
    %40 = arith.negf %39 : vector<8x128xf32>
    %41 = math.exp %40 : vector<8x128xf32>
    %cst_13 = arith.constant 1.000000e+00 : f32
    %42 = vector.broadcast %cst_13 : f32 to vector<8x128xf32>
    %43 = arith.addf %42, %41 : vector<8x128xf32>
    %44 = arith.divf %42, %43 : vector<8x128xf32>
    %c0_14 = arith.constant 0 : index
    %c0_15 = arith.constant 0 : index
    %45 = vector.load %arg21[%c0_14, %c0_15] : memref<8x128xf32, #tpu.memory_space<vmem>>, vector<8x128xf32>
    tpu.vector_store %arg21[%c0_14, %c0_15], %44 {strides = array<i32>} : memref<8x128xf32, #tpu.memory_space<vmem>>, vector<8x128xf32>,
    return
  }
  func.func @transform_0(%arg0: i32, %arg1: i32) -> (i32, i32) {
    %c0_i32 = arith.constant 0 : i32
    %c0_i32_0 = arith.constant 0 : i32
    %c0_i32_1 = arith.constant 0 : i32
    return %c0_i32, %c0_i32_0 : i32, i32
  }
  func.func @transform_1(%arg0: i32, %arg1: i32) -> (i32, i32) {
    %c0_i32 = arith.constant 0 : i32
    %c0_i32_0 = arith.constant 0 : i32
    %c0_i32_1 = arith.constant 0 : i32
    return %c0_i32, %c0_i32_0 : i32, i32
  }
  func.func @transform_2(%arg0: i32, %arg1: i32) -> (i32, i32) {
    %c0_i32 = arith.constant 0 : i32
    %c0_i32_0 = arith.constant 0 : i32
    %c0_i32_1 = arith.constant 0 : i32
    return %c0_i32, %c0_i32_0 : i32, i32
  }
  func.func @transform_3(%arg0: i32, %arg1: i32) -> (i32, i32) {
    %c0_i32 = arith.constant 0 : i32
    %c0_i32_0 = arith.constant 0 : i32
    %c0_i32_1 = arith.constant 0 : i32
    return %c0_i32, %c0_i32_0 : i32, i32
  }
  func.func @transform_4(%arg0: i32, %arg1: i32) -> (i32, i32) {
    %c0_i32 = arith.constant 0 : i32
    %c0_i32_0 = arith.constant 0 : i32
    %c0_i32_1 = arith.constant 0 : i32
    return %c0_i32, %c0_i32_0 : i32, i32
  }
  func.func @transform_5(%arg0: i32, %arg1: i32) -> (i32, i32) {
    %c0_i32 = arith.constant 0 : i32
    %c0_i32_0 = arith.constant 0 : i32
    %c0_i32_1 = arith.constant 0 : i32
    return %c0_i32, %c0_i32_0 : i32, i32
  }
  func.func @transform_6(%arg0: i32, %arg1: i32) -> (i32, i32) {
    %c0_i32 = arith.constant 0 : i32
    %c0_i32_0 = arith.constant 0 : i32
    %c0_i32_1 = arith.constant 0 : i32
    return %c0_i32, %c0_i32_0 : i32, i32
  }
  func.func @transform_7(%arg0: i32, %arg1: i32) -> (i32, i32) {
    %c0_i32 = arith.constant 0 : i32
    %c0_i32_0 = arith.constant 0 : i32
    %c0_i32_1 = arith.constant 0 : i32
    return %c0_i32, %c0_i32_0 : i32, i32
  }
  func.func @transform_8(%arg0: i32, %arg1: i32) -> (i32, i32) {
    %c0_i32 = arith.constant 0 : i32
    %c0_i32_0 = arith.constant 0 : i32
    %c0_i32_1 = arith.constant 0 : i32
    return %c0_i32, %c0_i32_0 : i32, i32
  }
  func.func @transform_9(%arg0: i32, %arg1: i32) -> (i32, i32) {
    %c0_i32 = arith.constant 0 : i32
    %c0_i32_0 = arith.constant 0 : i32
    %c0_i32_1 = arith.constant 0 : i32
    return %c0_i32, %c0_i32_0 : i32, i32
  }
  func.func @transform_10(%arg0: i32, %arg1: i32) -> (i32, i32) {
    %c0_i32 = arith.constant 0 : i32
    %c0_i32_0 = arith.constant 0 : i32
    %c0_i32_1 = arith.constant 0 : i32
    return %c0_i32, %c0_i32_0 : i32, i32
  }
  func.func @transform_11(%arg0: i32, %arg1: i32) -> (i32, i32) {
    %c0_i32 = arith.constant 0 : i32
    %c0_i32_0 = arith.constant 0 : i32
    %c0_i32_1 = arith.constant 0 : i32
    return %c0_i32, %c0_i32_0 : i32, i32
  }
  func.func @transform_12(%arg0: i32, %arg1: i32) -> (i32, i32) {
    %c0_i32 = arith.constant 0 : i32
    %c0_i32_0 = arith.constant 0 : i32
    %c0_i32_1 = arith.constant 0 : i32
    return %c0_i32, %c0_i32_0 : i32, i32
  }
  func.func @transform_13(%arg0: i32, %arg1: i32) -> (i32, i32) {
    %c0_i32 = arith.constant 0 : i32
    %c0_i32_0 = arith.constant 0 : i32
    %c0_i32_1 = arith.constant 0 : i32
    return %c0_i32, %c0_i32_0 : i32, i32
  }
  func.func @transform_14(%arg0: i32, %arg1: i32) -> (i32, i32) {
    %c0_i32 = arith.constant 0 : i32
    %c0_i32_0 = arith.constant 0 : i32
    %c0_i32_1 = arith.constant 0 : i32
    return %c0_i32, %c0_i32_0 : i32, i32
  }
  func.func @transform_15(%arg0: i32, %arg1: i32) -> (i32, i32) {
    %c0_i32 = arith.constant 0 : i32
    %c0_i32_0 = arith.constant 0 : i32
    %c0_i32_1 = arith.constant 0 : i32
    return %c0_i32, %c0_i32_0 : i32, i32
  }
  func.func @transform_16(%arg0: i32, %arg1: i32) -> (i32, i32) {
    %c0_i32 = arith.constant 0 : i32
    %c0_i32_0 = arith.constant 0 : i32
    %c0_i32_1 = arith.constant 0 : i32
    return %c0_i32, %c0_i32_0 : i32, i32
  }
  func.func @transform_17(%arg0: i32, %arg1: i32) -> (i32, i32) {
    %c0_i32 = arith.constant 0 : i32
    %c0_i32_0 = arith.constant 0 : i32
    %c0_i32_1 = arith.constant 0 : i32
    return %c0_i32, %c0_i32_0 : i32, i32
  }
  func.func @transform_18(%arg0: i32, %arg1: i32) -> (i32, i32) {
    %c0_i32 = arith.constant 0 : i32
    %c0_i32_0 = arith.constant 0 : i32
    %c0_i32_1 = arith.constant 0 : i32
    return %c0_i32, %c0_i32_0 : i32, i32
  }
  func.func @transform_19(%arg0: i32, %arg1: i32) -> (i32, i32) {
    %c1_i32 = arith.constant 1 : i32
    %0 = arith.muli %arg0, %c1_i32 : i32
    %1 = arith.addi %0, %arg1 : i32
    %c0_i32 = arith.constant 0 : i32
    %c0_i32_0 = arith.constant 0 : i32
    return %1, %c0_i32 : i32, i32
  }
}

</mosaic_0001>

<bundles_post_ra>
// kernel: tpu_custom_call.1
= control target key start
LH: loop header
LB: loop body
LE: loop exit
PB: predicated region body
PF: predicated region fallthrough
CT: control target
= control target key end

     0   :  { %s3456_s0 = inlined_call_operand.vmem [shape: f32[16,8], index: 0, kind: input, shape index: {}]   ;;  %s3457_s1 = inlined_call_operand.vmem [shape: f32[8,16], index: 1, kind: input, shape index: {}]   ;;  %s3458_s2 = inlined_call_operand.vmem [shape: bf16[16,16], index: 2, kind: input, shape index: {}]   ;;  %s3459_s3 = inlined_call_operand.vmem [shape: bf16[8,32], index: 3, kind: input, shape index: {}]   ;;  %s3460_s4 = inlined_call_operand.vmem [shape: f32[1,32], index: 4, kind: input, shape index: {}]   ;;  %s3461_s5 = inlined_call_operand.vmem [shape: bf16[32,8], index: 5, kind: input, shape index: {}]   ;;  %s3462_s6 = inlined_call_operand.vmem [shape: f32[32,1], index: 6, kind: input, shape index: {}]   ;;  %s3463_s7 = inlined_call_operand.vmem [shape: bf16[8,32], index: 7, kind: input, shape index: {}]   ;;  %s3464_s8 = inlined_call_operand.vmem [shape: f32[1,32], index: 8, kind: input, shape index: {}]   ;;  %s3465_s9 = inlined_call_operand.vmem [shape: f32[1,32], index: 9, kind: input, shape index: {}]   ;;  %s3466_s10 = inlined_call_operand.vmem [shape: f32[1,32], index: 10, kind: input, shape index: {}]   ;;  %s3467_s11 = inlined_call_operand.vmem [shape: bf16[32,128], index: 11, kind: input, shape index: {}]   ;;  %s3468_s12 = inlined_call_operand.vmem [shape: f32[1,128], index: 12, kind: input, shape index: {}]   ;;  %s3469_s13 = inlined_call_operand.vmem [shape: bf16[1,32], index: 13, kind: input, shape index: {}]   ;;  %s3470_s14 = inlined_call_operand.<no memory space> [shape: f32[1,1], index: 14, kind: input, shape index: {}]   ;;  %s3471_s15 = inlined_call_operand.vmem [shape: bf16[32,1], index: 15, kind: input, shape index: {}]   ;;  %s3472_s18 = inlined_call_operand.vmem [shape: f32[1,128], index: 18, kind: input, shape index: {}]   ;;  %s3473_s19 = inlined_call_operand.hbm [shape: f32[16,128], index: 19, kind: output, shape index: {}]   ;;  %s3474_s16 = inlined_call_operand.<no memory space> [shape: f32[1,1], index: 16, kind: input, shape index: {}]   ;;  %s3475_s17 = inlined_call_operand.<no memory space> [shape: f32[1,1], index: 17, kind: input, shape index: {}]  }
   0x1   :  { %3520 = sst [smem:[#allocation40_spill]] %s3456_s0  ;;  %v24_v0 = vstv %s3470_s14  ;;  %v26_v1 = vstv %s3474_s16  ;;  %v28_v2 = vstv %s3475_s17 }
   0x2   :  { %3521 = sst [smem:[#allocation41_spill]] %s3457_s1  ;;  %25 = vst [vmem:[#allocation5] sm:$0x1] %v24_v0  ;;  %27 = vst [vmem:[#allocation6] sm:$0x1] %v26_v1 }
   0x3   :  { %3522 = sst [smem:[#allocation42_spill]] %s3458_s2  ;;  %29 = vst [vmem:[#allocation7] sm:$0x1] %v28_v2 }
   0x4   :  { %3523 = sst [smem:[#allocation43_spill]] %s3459_s3 }
   0x5   :  { %3524 = sst [smem:[#allocation44_spill]] %s3460_s4 }
   0x6   :  { %3525 = sst [smem:[#allocation45_spill]] %s3461_s5 }
   0x7   :  { %3526 = sst [smem:[#allocation46_spill]] %s3462_s6 }
   0x8   :  { %3527 = sst [smem:[#allocation47_spill]] %s3463_s7 }
   0x9   :  { %3528 = sst [smem:[#allocation48_spill]] %s3464_s8 }
   0xa   :  { %30 = vsyncpa [#allocation9], 0 }
   0xb   :  { %32 = vsyncpa [#allocation9 + $0x1], 0  ;;  %s2662_s2 = smov 0   ;;  %s2664_s23 = smov 0  }
   0xc   :  { %s2666_s24 = smov 0   ;;  %s2668_s14 = smov 0  }
   0xd   :  { %s2670_s25 = smov 0   ;;  %s2672_s16 = smov 0  }
   0xe LB: > { %s2119_s17 = sadd.s32 4294967295, %s2516_s16   ;;  %s2120_s3 = sadd.s32 4294967294, %s2516_s16   ;;  %s2516_s16 = sphi %s2672_s16, %s38_s16   ;;  %s2512_s25 = sphi %s2670_s25, %s3615_s25   ;;  %s2508_s14 = sphi %s2668_s14, %s3614_s14   ;;  %s2504_s24 = sphi %s2666_s24, %s3613_s24   ;;  %s2500_s23 = sphi %s2664_s23, %s3612_s23   ;;  %s2496_s2 = sphi %s2662_s2, %s3611_s2  }
   0xf   : > { %s50_s26 = sadd.s32 1, %s2512_s25  ;;  %s458_s27 = sadd.s32 1, %s2504_s24 }
  0x10   : > { %p52_p0 = scmp.ge.s32.totalorder %s50_s26, 2  ;;  %p468_p1 = scmp.ne.s32.totalorder %s2504_s24, %s2500_s23 }
  0x11   : > { %p469_p2 = scmp.eq.s32.totalorder %s2119_s17, 1  ;;  %p474_p3 = scmp.ne.s32.totalorder %s2500_s23, %s2496_s2 }
  0x12   : > { %s3617_s26 = smov (%p52_p0, %s50_s26), 0  ;;  %p475_p5 = scmp.eq.s32.totalorder %s2120_s3, 1 }
  0x13   : > { %p2702_p4 = por %p469_p2, %p468_p1  ;;  %s455_s29 = ssub.s32 %s2512_s25, %s3617_s26 }
  0x14   : > { %p2122_p6 = scmp.ge.s32.totalorder %s2516_s16, 1  ;;  %p456_p7 = scmp.eq.s32.totalorder %s455_s29, 0 }
  0x15   : > { %p2709_p8 = por %p475_p5, %p474_p3  ;;  %p550_p9 = scmp.lt.s32.totalorder %s2516_s16, 3 }
  0x16   : > { %s2715_s30 = scalar_select %p456_p7, %s2504_s24, %s458_s27  }
  0x17   : > { %p551_p10 = pnand %p2122_p6, %p550_p9 }
  0x19   : > { %554 = sbr.rel (%p551_p10) target bundleno = 2092 (0x82c), region = 96 }
  0x20   : > { %vm628_vm0 = vcmask 1043456   ;;  %s3531_s7 = sld [smem:[#allocation47_spill]]  ;;  %s3532_s17 = sld [smem:[#allocation40_spill]]  ;;  %v3478_v5 = vmov 0.0   ;;  %vm2519_vm1 = vmmov 0   ;;  %vm624_vm2 = vcmask 64512  }
  0x21   : > { %2184 = vmatprep.subr.bf16.mxu1 %v3478_v5  ;;  %2186 = vmatprep.mubr.msk.bf16.mxu1 %vm2519_vm1, %v3478_v5  ;;  %s3533_s21 = sld [smem:[#allocation43_spill]]  ;;  %s3534_s22 = sld [smem:[#allocation41_spill]]  ;;  %v2520_v15 = vmov 3   ;;  %v2749_v16 = vld [vmem:[%s3465_s9] ss:$0 sm:$0xff]  ;;  %v2521_v17 = vmov 1  }
  0x22   : > { %2178 = vmatprep.subr.bf16.mxu0 %v3478_v5  ;;  %2180 = vmatprep.mubr.msk.bf16.mxu0 %vm2519_vm1, %v3478_v5  ;;  %s3535_s5 = sld [smem:[#allocation45_spill]]  ;;  %v2522_v19 = vmov 4   ;;  %v2523_v20 = vmov 2   ;;  %v2524_v21 = vmov 5   ;;  %v2525_v22 = vmov 6   ;;  %s3536_s6 = sld [smem:[#allocation46_spill]] }
  0x23   : > { %2322 = vset.pattern.permute.xlu1 %v2520_v15  ;;  %2320 = vset.pattern.permute.xlu0 %v2521_v17  ;;  %v3491_v23 = vmov 19   ;;  %v2527_v24 = vmov 7   ;;  %v3490_v25 = vmov 20   ;;  %v2529_v26 = vmov 8   ;;  %s3537_s8 = sld [smem:[#allocation48_spill]]  ;;  %s3538_s4 = sld [smem:[#allocation44_spill]] }
  0x24   : > { %926 = vperm.xlu1 %2322, %v2749_v16   ;;  %874 = vperm.xlu0 %2320, %v2749_v16   ;;  %v3489_v27 = vmov 21   ;;  %v2531_v28 = vmov 9   ;;  %v3488_v29 = vmov 22   ;;  %v2533_v30 = vmov 10   ;;  %s3553_s20 = sld [smem:[#allocation42_spill]]  ;;  %s2152_s29 = sshll.u32 %s2508_s14, 7 }
  0x25   : > { %v3487_v31 = vmov 23   ;;  %v3480_v33 = vmov 0   ;;  %v3486_v34 = vmov 24   ;;  %v2537_v36 = vmov 11  }
  0x26   : > { %v673_v3 = vld [vmem:[%s3531_s7] sm:$0xf]  ;;  %v608_v7 = vld [vmem:[%s3532_s17 + $0x8] sm:$0xff]  ;;  %v2538_v37 = vmov 12   ;;  %v2539_v39 = vmov 13   ;;  %v2540_v40 = vmov 14  }
  0x27   : > { %v607_v4 = vld [vmem:[%s3532_s17] sm:$0xff]  ;;  %v682_v6 = vsel %vm628_vm0, %v673_v3, 0  ;;  %v2541_v41 = vmov 15   ;;  %v2542_v42 = vmov 16   ;;  %v2543_v43 = vmov 17  }
  0x28   : > { %v616_v8 = vld [vmem:[%s3533_s21] sm:$0xf]  ;;  %2185 = vmatpush3.bf16.msra.mxu1 %v682_v6  ;;  %v609_v10 = vpack.c.bf16 %v608_v7, %v607_v4  ;;  %v2416_v18 = vld [vmem:[%s3535_s5 + $0x8] sm:$0xff]   ;;  %2323 = vset.pattern.permute.xlu1 %v2522_v19  ;;  %v731_v32 = vld [vmem:[%s3536_s6 + $0x10] sm:$0xff]  ;;  %v2544_v44 = vmov 18   ;;  %vm1661_vm3 = vcmask 130048  }
  0x29   : > { %v610_v9 = vld [vmem:[%s3534_s22] sm:$0xff]  ;;  %v630_v11 = vsel %vm628_vm0, %v616_v8, 0  ;;  %2196 = vmatprep.subr.bf16.mxu1 %v3478_v5  ;;  %952 = vperm.xlu1 %2323, %v2749_v16   ;;  %v730_v38 = vld [vmem:[%s3536_s6 + $0x8] sm:$0xff]  ;;  %v732_v45 = vld [vmem:[%s3536_s6 + $0x18] sm:$0xff]  ;;  %vm1763_vm4 = vcmask 261120   ;;  %vm1874_vm5 = vcmask 7168  }
  0x2a   : > { %v611_v12 = vpack.c.bf16 %v610_v9, %v610_v9  ;;  %2179 = vmatpush3.bf16.msra.mxu0 %v630_v11  ;;  %v2415_v13 = vld [vmem:[%s3535_s5] sm:$0xff]   ;;  %2321 = vset.pattern.permute.xlu0 %v2523_v20  ;;  %s2144_s22 = sshll.u32 %s2508_s14, 3  ;;  %vm1931_vm6 = vcmask 122880   ;;  %s2552_s14 = smov [#allocation8]  }
  0x2b   : > { %2187 = vmatmul.mubr.msk.bf16.vlgmr.msra.gmra.mrb[0].mxu1 %vm624_vm2, %v609_v10  ;;  %900 = vperm.xlu0 %2321, %v2749_v16   ;;  %v729_v35 = vld [vmem:[%s3536_s6] sm:$0xff]  ;;  %s1935_s3 = scalar_lea.vmem [#allocation4], %s2144_s22  ;;  %s1939_s27 = sshra.s32 %s2144_s22, 3 }
  0x2c   : > { %2230 = vmatprep.subr.msk.bf16.mxu0 %vm628_vm0, %v611_v12  ;;  %v770_v14 = vsel %vm628_vm0, %v611_v12, 0  ;;  %2198 = vmatprep.mubr.msk.bf16.mxu1 %vm2519_vm1, %v3478_v5  ;;  %v2126_v46 = vld [vmem:[%s3537_s8] ss:$0 sm:$0xff]  ;;  %s2145_s7 = sshll.u32 %s1939_s27, 2  ;;  %s598_s27 = sand.u32 1, %s2500_s23  }
  0x2d   : > { %2181 = vmatmul.mubr.msk.bf16.vlgmr.msra.gmra.mrb[0].mxu0 %vm624_vm2, %v609_v10  ;;  %2324 = vset.pattern.permute.xlu1 %v2524_v21  ;;  %v2124_v47 = vld [vmem:[%s3538_s4] ss:$0 sm:$0xff]  ;;  %s1942_s1 = scalar_lea.vmem %s3553_s20, %s2145_s7  ;;  %s2123_s7 = sshll.u32 %s598_s27, 3 }
  0x2e   : > { %2191 = vmatpush3.bf16.msra.mxu0 %v770_v14  ;;  %2192 = vmatprep.mubr.msk.bf16.mxu0 %vm624_vm2, %v2415_v13  ;;  %s600_s21 = scalar_lea.vmem [#allocation8], %s2123_s7  ;;  %s3409_s22 = scalar_lea.hbm %s3473_s19, %s2152_s29 }
  0x2f   : > { %2202 = vmatprep.subr.bf16.mxu0 %v3478_v5  ;;  %978 = vperm.xlu1 %2324, %v2749_v16   ;;  %s2442_s7 = sshll.u32 %s2552_s14, 4  ;;  %s2443_s7 = int_to_ptr.vmem [resolvable:$false] %s2442_s7 }
  0x30   : > { %2340 = vset.pattern.permute.xlu0 %v3491_v23  ;;  %s2444_s8 = scalar_lea.vmem %s2443_s7, 256 }
  0x31   : > { %1342 = vperm.xlu0 %2340, %v2749_v16  }
  0x33   : > { %2325 = vset.pattern.permute.xlu1 %v2525_v22 }
  0x34   : > { %1004 = vperm.xlu1 %2325, %v2749_v16  }
  0x35   : > { %2193 = vmatmul.mubr.msk.bf16.vlgmr.msra.gmra.mrb[4].mxu0 %vm624_vm2, %v2416_v18  ;;  %2341 = vset.pattern.permute.xlu0 %v3490_v25 }
  0x36   : > { %2206 = vmatprep.mubr.msk.bf16.mxu0 %vm2519_vm1, %v3478_v5  ;;  %1368 = vperm.xlu0 %2341, %v2749_v16  }
  0x38   : > { %2326 = vset.pattern.permute.xlu1 %v2527_v24 }
  0x39   : > { %1030 = vperm.xlu1 %2326, %v2749_v16  }
  0x3a   : > { %2342 = vset.pattern.permute.xlu0 %v3489_v27 }
  0x3b   : > { %1394 = vperm.xlu0 %2342, %v2749_v16  }
  0x3d   : > { %2327 = vset.pattern.permute.xlu1 %v2529_v26 }
  0x3e   : > { %1056 = vperm.xlu1 %2327, %v2749_v16  }
  0x3f   : > { %2343 = vset.pattern.permute.xlu0 %v3488_v29 }
  0x40   : > { %1420 = vperm.xlu0 %2343, %v2749_v16  }
  0x42   : > { %2328 = vset.pattern.permute.xlu1 %v2531_v28 }
  0x43   : > { %1082 = vperm.xlu1 %2328, %v2749_v16  }
  0x44   : > { %2344 = vset.pattern.permute.xlu0 %v3487_v31 }
  0x45   : > { %1446 = vperm.xlu0 %2344, %v2749_v16  }
  0x47   : > { %2329 = vset.pattern.permute.xlu1 %v2533_v30 }
  0x48   : > { %1108 = vperm.xlu1 %2329, %v2749_v16  }
  0x49   : > { %2345 = vset.pattern.permute.xlu0 %v3486_v34 }
  0x4a   : > { %1472 = vperm.xlu0 %2345, %v2749_v16  }
  0x4c   : > { %2330 = vset.pattern.permute.xlu1 %v3480_v33 }
  0x4d   : > { %745 = vperm.xlu1 %2330, %v731_v32  }
  0x4e   : > { %2346 = vset.pattern.permute.xlu0 %v3480_v33 }
  0x4f   : > { %735 = vperm.xlu0 %2346, %v729_v35  }
  0x51   : > { %2331 = vset.pattern.permute.xlu1 %v2537_v36 }
  0x52   : > { %1134 = vperm.xlu1 %2331, %v2749_v16  }
  0x53   : > { %848 = vperm.xlu0 %2346, %v2749_v16  }
  0x56   : > { %2332 = vset.pattern.permute.xlu1 %v2538_v37 }
  0x57   : > { %1160 = vperm.xlu1 %2332, %v2749_v16   ;;  %740 = vperm.xlu0 %2346, %v730_v38  }
  0x5b   : > { %2333 = vset.pattern.permute.xlu1 %v2539_v39 }
  0x5c   : > { %1186 = vperm.xlu1 %2333, %v2749_v16  }
  0x60   : > { %2334 = vset.pattern.permute.xlu1 %v2540_v40 }
  0x61   : > { %1212 = vperm.xlu1 %2334, %v2749_v16  }
  0x65   : > { %2335 = vset.pattern.permute.xlu1 %v2541_v41 }
  0x66   : > { %1238 = vperm.xlu1 %2335, %v2749_v16  }
  0x6a   : > { %2336 = vset.pattern.permute.xlu1 %v2542_v42 }
  0x6b   : > { %1264 = vperm.xlu1 %2336, %v2749_v16  }
  0x6f   : > { %2337 = vset.pattern.permute.xlu1 %v2543_v43 }
  0x70   : > { %1290 = vperm.xlu1 %2337, %v2749_v16  }
  0x74   : > { %2338 = vset.pattern.permute.xlu1 %v2544_v44 }
  0x75   : > { %1316 = vperm.xlu1 %2338, %v2749_v16  }
  0x79   : > { %2339 = vset.pattern.permute.xlu1 %v3480_v33 }
  0x7a   : > { %750 = vperm.xlu1 %2339, %v732_v45   ;;  %v3482_v45 = vmov 28  }
  0x7e   : > { %2347 = vset.pattern.permute.xlu1 %v2521_v17 }
  0xa3   : > { %v2861_v0 = vpop.permute.xlu1 %926  ;;  %v2913_v10 = vpop.permute.xlu0 %874 }
  0xa4   : > { %3539 = vst [vmem:[#allocation11_spill] sm:$0xff] %v2861_v0 }
  0xa8   : > { %v2869_v1 = vpop.permute.xlu1 %952 }
  0xa9   : > { %3540 = vst [vmem:[#allocation12_spill] sm:$0xff] %v2869_v1 }
  0xaa   : > { %v2921_v12 = vpop.permute.xlu0 %900 }
  0xae   : > { %v2875_v2 = vpop.permute.xlu1 %978 }
  0xaf   : > { %3541 = vst [vmem:[#allocation13_spill] sm:$0xff] %v2875_v2 }
  0xb0   : > { %v2929_v14 = vpop.permute.xlu0 %1342 }
  0xb3   : > { %v2881_v3 = vpop.permute.xlu1 %1004 }
  0xb4   : > { %3542 = vst [vmem:[#allocation14_spill] sm:$0xff] %v2881_v3 }
  0xb8   : > { %v2889_v6 = vpop.permute.xlu1 %1030 }
  0xb9   : > { %3543 = vst [vmem:[#allocation15_spill] sm:$0xff] %v2889_v6 }
  0xbd   : > { %v2897_v7 = vpop.permute.xlu1 %1056 }
  0xbe   : > { %3544 = vst [vmem:[#allocation16_spill] sm:$0xff] %v2897_v7 }
  0xc2   : > { %v2905_v8 = vpop.permute.xlu1 %1082 }
  0xc3   : > { %3545 = vst [vmem:[#allocation17_spill] sm:$0xff] %v2905_v8 }
  0xc7   : > { %v2911_v9 = vpop.permute.xlu1 %1108 }
  0xc8   : > { %3546 = vst [vmem:[#allocation18_spill] sm:$0xff] %v2911_v9 }
  0xcc   : > { %v2919_v11 = vpop.permute.xlu1 %745 }
  0xd1   : > { %v2927_v13 = vpop.permute.xlu1 %1134 }
  0xd2   : > { %3547 = vst [vmem:[#allocation19_spill] sm:$0xff] %v2927_v13 }
  0xd6   : > { %v2937_v18 = vpop.permute.xlu1 %1160 }
  0xd7   : > { %3548 = vst [vmem:[#allocation20_spill] sm:$0xff] %v2937_v18 }
  0xfe   : > { %v718_v48 = vpop.f32.mrb[0].mxu1 }
  0xff   : > { %v2834_v49 = vadd.f32 %v2126_v46, %v718_v48  ;;  %v2188_v50 = vpop.f32.mrb[1].mxu1 }
 0x100   : > { %v666_v51 = vpop.f32.mrb[0].mxu0  ;;  %v721_v52 = vpop.f32.mrb[2].mxu1 }
 0x101   : > { %v667_v53 = vadd.f32 %v2124_v47, %v666_v51  ;;  %v2182_v54 = vpop.f32.mrb[1].mxu0  ;;  %856 = vperm.xlu1 %2347, %v2834_v49   ;;  %824 = vperm.xlu0 %2346, %v2834_v49   ;;  %v2189_v55 = vpop.f32.mrb[3].mxu1  ;;  %v2887_v4 = vadd.f32 %v2126_v46, %v721_v52 }
 0x102   : > { %v669_v56 = vpop.f32.mrb[2].mxu0 }
 0x103   : > { %v670_v57 = vadd.f32 %v2124_v47, %v669_v56  ;;  %v2183_v58 = vpop.f32.mrb[3].mxu0  ;;  %v3481_v47 = vmov 29  }
 0x105   : > { %v1685_v59 = vpack.c.bf16 %v670_v57, %v667_v53  ;;  %2348 = vset.pattern.permute.xlu1 %v2523_v20  ;;  %2360 = vset.pattern.permute.xlu0 %v2540_v40 }
 0x106   : > { %882 = vperm.xlu1 %2348, %v2834_v49   ;;  %1194 = vperm.xlu0 %2360, %v2834_v49  }
 0x107   : > { %2197 = vmatpush3.bf16.msra.mxu1 %v1685_v59 }
 0x108   : > { %v2842_v60 = vpop.f32.mrb[4].mxu0  ;;  %2210 = vmatprep.subr.bf16.mxu1 %v3478_v5 }
 0x109   : > { %v2844_v61 = vpop.f32.mrb[5].mxu0 }
 0x10a   : > { %v2847_v62 = vpop.f32.mrb[6].mxu0  ;;  %2349 = vset.pattern.permute.xlu1 %v2520_v15  ;;  %2361 = vset.pattern.permute.xlu0 %v2541_v41 }
 0x10b   : > { %v2851_v63 = vpop.f32.mrb[7].mxu0  ;;  %908 = vperm.xlu1 %2349, %v2834_v49   ;;  %1220 = vperm.xlu0 %2361, %v2834_v49  }
 0x10f   : > { %2350 = vset.pattern.permute.xlu1 %v2522_v19  ;;  %2362 = vset.pattern.permute.xlu0 %v2542_v42 }
 0x110   : > { %934 = vperm.xlu1 %2350, %v2834_v49   ;;  %1246 = vperm.xlu0 %2362, %v2834_v49  }
 0x114   : > { %2351 = vset.pattern.permute.xlu1 %v2524_v21  ;;  %2363 = vset.pattern.permute.xlu0 %v2543_v43 }
 0x115   : > { %960 = vperm.xlu1 %2351, %v2834_v49   ;;  %1272 = vperm.xlu0 %2363, %v2834_v49  }
 0x119   : > { %2352 = vset.pattern.permute.xlu1 %v2525_v22  ;;  %2364 = vset.pattern.permute.xlu0 %v2544_v44 }
 0x11a   : > { %986 = vperm.xlu1 %2352, %v2834_v49   ;;  %1298 = vperm.xlu0 %2364, %v2834_v49  }
 0x11e   : > { %2353 = vset.pattern.permute.xlu1 %v2527_v24  ;;  %2365 = vset.pattern.permute.xlu0 %v3491_v23 }
 0x11f   : > { %1012 = vperm.xlu1 %2353, %v2834_v49   ;;  %1324 = vperm.xlu0 %2365, %v2834_v49  }
 0x123   : > { %2354 = vset.pattern.permute.xlu1 %v2529_v26  ;;  %2366 = vset.pattern.permute.xlu0 %v3490_v25 }
 0x124   : > { %1038 = vperm.xlu1 %2354, %v2834_v49   ;;  %1350 = vperm.xlu0 %2366, %v2834_v49  }
 0x128   : > { %2355 = vset.pattern.permute.xlu1 %v2531_v28  ;;  %2367 = vset.pattern.permute.xlu0 %v3489_v27 }
 0x129   : > { %1064 = vperm.xlu1 %2355, %v2834_v49   ;;  %1376 = vperm.xlu0 %2367, %v2834_v49  }
 0x12d   : > { %2356 = vset.pattern.permute.xlu1 %v2533_v30  ;;  %2375 = vset.pattern.permute.xlu0 %v2521_v17  ;;  %v3485_v17 = vmov 25  }
 0x12e   : > { %1090 = vperm.xlu1 %2356, %v2834_v49   ;;  %860 = vperm.xlu0 %2375, %v2887_v4  }
 0x132   : > { %2357 = vset.pattern.permute.xlu1 %v2537_v36  ;;  %2380 = vset.pattern.permute.xlu0 %v2525_v22  ;;  %v2939_v22 = vpop.permute.xlu0 %1368 }
 0x133   : > { %1116 = vperm.xlu1 %2357, %v2834_v49   ;;  %990 = vperm.xlu0 %2380, %v2887_v4  }
 0x137   : > { %2358 = vset.pattern.permute.xlu1 %v2538_v37  ;;  %2381 = vset.pattern.permute.xlu0 %v2527_v24  ;;  %v3484_v24 = vmov 26  }
 0x138   : > { %1142 = vperm.xlu1 %2358, %v2834_v49   ;;  %1016 = vperm.xlu0 %2381, %v2887_v4  }
 0x13c   : > { %2359 = vset.pattern.permute.xlu1 %v2539_v39  ;;  %2382 = vset.pattern.permute.xlu0 %v2529_v26  ;;  %v2947_v26 = vpop.permute.xlu1 %1186 }
 0x13d   : > { %1168 = vperm.xlu1 %2359, %v2834_v49   ;;  %1042 = vperm.xlu0 %2382, %v2887_v4  }
 0x140   : > { %v2955_v32 = vpop.permute.xlu1 %1212 }
 0x141   : > { %2368 = vset.pattern.permute.xlu1 %v3488_v29  ;;  %2383 = vset.pattern.permute.xlu0 %v2531_v28  ;;  %v2949_v28 = vpop.permute.xlu0 %1394 }
 0x142   : > { %1402 = vperm.xlu1 %2368, %v2834_v49   ;;  %1068 = vperm.xlu0 %2383, %v2887_v4  }
 0x145   : > { %v2957_v35 = vpop.permute.xlu0 %1420 }
 0x146   : > { %2369 = vset.pattern.permute.xlu1 %v3487_v31  ;;  %2384 = vset.pattern.permute.xlu0 %v2533_v30  ;;  %v3483_v30 = vmov 27  }
 0x147   : > { %1428 = vperm.xlu1 %2369, %v2834_v49   ;;  %1094 = vperm.xlu0 %2384, %v2887_v4  }
 0x14b   : > { %2370 = vset.pattern.permute.xlu1 %v3486_v34  ;;  %2385 = vset.pattern.permute.xlu0 %v2537_v36  ;;  %v2963_v36 = vpop.permute.xlu1 %1238 }
 0x14c   : > { %1454 = vperm.xlu1 %2370, %v2834_v49   ;;  %1120 = vperm.xlu0 %2385, %v2887_v4  }
 0x14f   : > { %v2971_v38 = vpop.permute.xlu1 %1264 }
 0x150   : > { %2371 = vset.pattern.permute.xlu1 %v3485_v17  ;;  %2386 = vset.pattern.permute.xlu0 %v2538_v37  ;;  %v2965_v37 = vpop.permute.xlu0 %1446 }
 0x151   : > { %1480 = vperm.xlu1 %2371, %v2834_v49   ;;  %1146 = vperm.xlu0 %2386, %v2887_v4  }
 0x155   : > { %2372 = vset.pattern.permute.xlu1 %v3484_v24  ;;  %2387 = vset.pattern.permute.xlu0 %v2539_v39  ;;  %v2973_v39 = vpop.permute.xlu0 %1472 }
 0x156   : > { %1506 = vperm.xlu1 %2372, %v2834_v49   ;;  %1172 = vperm.xlu0 %2387, %v2887_v4  }
 0x159   : > { %v736_v46 = vpop.permute.xlu0 %735 }
 0x15a   : > { %2373 = vset.pattern.permute.xlu1 %v3483_v30  ;;  %2388 = vset.pattern.permute.xlu0 %v3485_v17  ;;  %v2995_v51 = vadd.f32 %v2844_v61, %v736_v46 }
 0x15b   : > { %1532 = vperm.xlu1 %2373, %v2834_v49   ;;  %1498 = vperm.xlu0 %2388, %v2749_v16  }
 0x15f   : > { %2374 = vset.pattern.permute.xlu1 %v3480_v33  ;;  %2404 = vset.pattern.permute.xlu0 %v3484_v24 }
 0x160   : > { %1524 = vperm.xlu0 %2404, %v2749_v16   ;;  %829 = vperm.xlu1 %2374, %v2887_v4  }
 0x164   : > { %2406 = vset.pattern.permute.xlu0 %v3483_v30  ;;  %2376 = vset.pattern.permute.xlu1 %v2523_v20  ;;  %v2980_v20 = vpop.permute.xlu1 %1290 }
 0x165   : > { %1550 = vperm.xlu0 %2406, %v2749_v16   ;;  %886 = vperm.xlu1 %2376, %v2887_v4  }
 0x168   : > { %v2988_v48 = vpop.permute.xlu1 %1316 }
 0x169   : > { %2377 = vset.pattern.permute.xlu1 %v2520_v15  ;;  %2408 = vset.pattern.permute.xlu0 %v3482_v45  ;;  %v832_v15 = vlaneseq }
 0x16a   : > { %912 = vperm.xlu1 %2377, %v2887_v4   ;;  %1576 = vperm.xlu0 %2408, %v2749_v16  }
 0x16b   : > { %v833_v50 = vshrl.u32 %v832_v15, 7 }
 0x16d   : > { %v2999_v52 = vsub.s32 0, %v833_v50  ;;  %v3001_v53 = vsub.s32 1, %v833_v50  ;;  %v3016_v58 = vsub.s32 2, %v833_v50  ;;  %v3018_v59 = vsub.s32 6, %v833_v50 }
 0x16e   : > { %2378 = vset.pattern.permute.xlu1 %v2522_v19  ;;  %2410 = vset.pattern.permute.xlu0 %v3481_v47  ;;  %v2990_v19 = vpop.permute.xlu0 %848  ;;  %v3057_v29 = vsub.s32 4, %v833_v50 }
 0x16f   : > { %938 = vperm.xlu1 %2378, %v2887_v4   ;;  %1602 = vperm.xlu0 %2410, %v2749_v16   ;;  %3549 = vst [vmem:[#allocation21_spill] sm:$0xff] %v2990_v19  ;;  %v2997_v16 = vpop.permute.xlu1 %750  ;;  %3550 = vst [vmem:[#allocation22_spill] sm:$0xff] %v2999_v52  ;;  %v3006_v54 = vrot.slane %v2995_v51, %v2999_v52  ;;  %v3025_v46 = vrot.slane %v2995_v51, %v3016_v58 }
 0x170   : > { %3551 = vst [vmem:[#allocation23_spill] sm:$0xff] %v3018_v59  ;;  %3557 = vst [vmem:[#allocation28_spill] sm:$0xff] %v3057_v29 }
 0x173   : > { %2379 = vset.pattern.permute.xlu1 %v2524_v21  ;;  %2414 = vset.pattern.permute.xlu0 %v3480_v33  ;;  %v741_v21 = vpop.permute.xlu0 %740  ;;  %v3039_v33 = vsub.s32 7, %v833_v50 }
 0x174   : > { %964 = vperm.xlu1 %2379, %v2887_v4   ;;  %v3014_v55 = vadd.f32 %v2851_v63, %v741_v21  ;;  %v3035_v21 = vld [vmem:[%s3553_s20] sm:$0xff]  }
 0x175   : > { %3554 = vst [vmem:[#allocation25_spill] sm:$0xff] %v3035_v21  ;;  %3555 = vst [vmem:[#allocation26_spill] sm:$0xff] %v3039_v33 }
 0x176   : > { %v3029_v63 = vrot.slane %v3014_v55, %v3018_v59 }
 0x178   : > { %2389 = vset.pattern.permute.xlu1 %v2540_v40  ;;  %v3011_v40 = vrot.slane %v2995_v51, %v3001_v53  ;;  %3552 = vst [vmem:[#allocation24_spill] sm:$0xff] %v3029_v63 }
 0x179   : > { %1198 = vperm.xlu1 %2389, %v2887_v4  }
 0x17d   : > { %2390 = vset.pattern.permute.xlu1 %v2541_v41 }
 0x17e   : > { %1224 = vperm.xlu1 %2390, %v2887_v4  }
 0x180   : > { %v857_v56 = vpop.permute.xlu1 %856  ;;  %v825_v57 = vpop.permute.xlu0 %824 }
 0x181   : > { %v836_v41 = vadd.f32 %v3006_v54, %v825_v57  ;;  %v867_v61 = vadd.f32 %v3011_v40, %v857_v56 }
 0x182   : > { %2391 = vset.pattern.permute.xlu1 %v2542_v42  ;;  %v3037_v42 = vsub.s32 3, %v833_v50 }
 0x183   : > { %v838_v15 = vmul.f32 0.2, %v836_v41  ;;  %1250 = vperm.xlu1 %2391, %v2887_v4   ;;  %v869_v47 = vmul.f32 0.2, %v867_v61 }
 0x184   : > { %v3048_v24 = vrot.slane %v2995_v51, %v3037_v42 }
 0x185   : > { %v840_v57 = vmax.f32 %v836_v41, %v838_v15  ;;  %v883_v56 = vpop.permute.xlu1 %882  ;;  %v1195_v5 = vpop.permute.xlu0 %1194  ;;  %v3052_v41 = vrot.slane %v3014_v55, %v3039_v33  ;;  %v2157_v15 = vunpack.c.l.bf16 %v3035_v21 }
 0x186   : > { %v893_v45 = vadd.f32 %v3025_v46, %v883_v56  ;;  %v3043_v30 = vadd.f32 %v3029_v63, %v1195_v5  ;;  %v871_v56 = vmax.f32 %v867_v61, %v869_v47 }
 0x187   : > { %2392 = vset.pattern.permute.xlu1 %v2543_v43  ;;  %3556 = vst [vmem:[#allocation27_spill] sm:$0xff] %v3052_v41  ;;  %v851_v17 = vmul.f32 %v2990_v19, %v840_v57  ;;  %v3066_v57 = vrot.slane %v2995_v51, %v3057_v29 }
 0x188   : > { %v895_v34 = vmul.f32 0.2, %v893_v45  ;;  %1276 = vperm.xlu1 %2392, %v2887_v4   ;;  %v877_v47 = vmul.f32 %v2913_v10, %v871_v56 }
 0x189   : > { %v853_v25 = vadd.f32 %v2157_v15, %v851_v17  ;;  %v3559_v17 = vmov 19  }
 0x18a   : > { %v909_v5 = vpop.permute.xlu1 %908  ;;  %v1221_v31 = vpop.permute.xlu0 %1220  ;;  %v897_v23 = vmax.f32 %v893_v45, %v895_v34 }
 0x18b   : > { %v919_v43 = vadd.f32 %v3048_v24, %v909_v5  ;;  %v3061_v27 = vadd.f32 %v3052_v41, %v1221_v31  ;;  %v3072_v5 = vsub.s32 5, %v833_v50  ;;  %v879_v31 = vadd.f32 %v877_v47, %v853_v25 }
 0x18c   : > { %2393 = vset.pattern.permute.xlu1 %v2544_v44  ;;  %v903_v34 = vmul.f32 %v2921_v12, %v897_v23  ;;  %v3561_v47 = vmov 20  }
 0x18d   : > { %v921_v63 = vmul.f32 0.2, %v919_v43  ;;  %1302 = vperm.xlu1 %2393, %v2887_v4   ;;  %3558 = vst [vmem:[#allocation29_spill] sm:$0xff] %v3072_v5  ;;  %v3079_v45 = vrot.slane %v2995_v51, %v3072_v5 }
 0x18f   : > { %v923_v61 = vmax.f32 %v919_v43, %v921_v63  ;;  %v935_v19 = vpop.permute.xlu1 %934  ;;  %v3070_v21 = vpop.permute.xlu0 %1246  ;;  %3560 = vst [vmem:[#allocation30_spill] sm:$0xff] %v3079_v45  ;;  %v905_v63 = vadd.f32 %v903_v34, %v879_v31 }
 0x190   : > { %v945_v44 = vadd.f32 %v3066_v57, %v935_v19 }
 0x191   : > { %2394 = vset.pattern.permute.xlu1 %v3559_v17  ;;  %v929_v15 = vmul.f32 %v2861_v0, %v923_v61  ;;  %v3090_v17 = vrot.slane %v2995_v51, %v3018_v59 }
 0x192   : > { %v947_v56 = vmul.f32 0.2, %v945_v44  ;;  %1328 = vperm.xlu1 %2394, %v2887_v4  }
 0x193   : > { %v931_v25 = vadd.f32 %v929_v15, %v905_v63  ;;  %v3562_v63 = vmov 21  }
 0x194   : > { %v949_v43 = vmax.f32 %v945_v44, %v947_v56  ;;  %v961_v50 = vpop.permute.xlu1 %960  ;;  %v3083_v41 = vpop.permute.xlu0 %1272 }
 0x195   : > { %v971_v23 = vadd.f32 %v3079_v45, %v961_v50 }
 0x196   : > { %v955_v19 = vmul.f32 %v2869_v1, %v949_v43  ;;  %2395 = vset.pattern.permute.xlu1 %v3561_v47  ;;  %v3100_v43 = vrot.slane %v2995_v51, %v3039_v33 }
 0x197   : > { %v973_v61 = vmul.f32 0.2, %v971_v23  ;;  %1354 = vperm.xlu1 %2395, %v2887_v4  }
 0x198   : > { %v957_v0 = vadd.f32 %v955_v19, %v931_v25 }
 0x199   : > { %v975_v31 = vmax.f32 %v971_v23, %v973_v61  ;;  %v987_v34 = vpop.permute.xlu1 %986  ;;  %v3093_v44 = vpop.permute.xlu0 %1298 }
 0x19a   : > { %v997_v56 = vadd.f32 %v3090_v17, %v987_v34  ;;  %v3563_v34 = vmov 22  }
 0x19b   : > { %v981_v15 = vmul.f32 %v2875_v2, %v975_v31  ;;  %2396 = vset.pattern.permute.xlu1 %v3562_v63  ;;  %v3110_v31 = vrot.slane %v3014_v55, %v2999_v52 }
 0x19c   : > { %v999_v50 = vmul.f32 0.2, %v997_v56  ;;  %1380 = vperm.xlu1 %2396, %v2887_v4  }
 0x19d   : > { %v983_v47 = vadd.f32 %v981_v15, %v957_v0  ;;  %3564 = vst [vmem:[#allocation31_spill] sm:$0xff] %v3110_v31 }
 0x19e   : > { %v1001_v1 = vmax.f32 %v997_v56, %v999_v50  ;;  %v1013_v25 = vpop.permute.xlu1 %1012  ;;  %v3103_v23 = vpop.permute.xlu0 %1324 }
 0x19f   : > { %v1023_v19 = vadd.f32 %v3100_v43, %v1013_v25  ;;  %v3565_v25 = vmov 23  }
 0x1a0   : > { %v1007_v61 = vmul.f32 %v2881_v3, %v1001_v1  ;;  %2397 = vset.pattern.permute.xlu1 %v3563_v34  ;;  %v3120_v1 = vrot.slane %v3014_v55, %v3001_v53 }
 0x1a1   : > { %v1025_v51 = vmul.f32 0.2, %v1023_v19  ;;  %1406 = vperm.xlu1 %2397, %v2887_v4  }
 0x1a2   : > { %v1009_v63 = vadd.f32 %v1007_v61, %v983_v47  ;;  %3566 = vst [vmem:[#allocation32_spill] sm:$0xff] %v3120_v1 }
 0x1a3   : > { %v1027_v2 = vmax.f32 %v1023_v19, %v1025_v51  ;;  %v1039_v0 = vpop.permute.xlu1 %1038  ;;  %v3113_v56 = vpop.permute.xlu0 %1350 }
 0x1a4   : > { %v1049_v15 = vadd.f32 %v3110_v31, %v1039_v0  ;;  %v3567_v0 = vmov 24  }
 0x1a5   : > { %v1033_v50 = vmul.f32 %v2889_v6, %v1027_v2  ;;  %2398 = vset.pattern.permute.xlu1 %v3565_v25  ;;  %v3130_v2 = vrot.slane %v3014_v55, %v3016_v58 }
 0x1a6   : > { %v1051_v34 = vmul.f32 0.2, %v1049_v15  ;;  %1432 = vperm.xlu1 %2398, %v2887_v4  }
 0x1a7   : > { %v1035_v3 = vadd.f32 %v1033_v50, %v1009_v63  ;;  %3568 = vst [vmem:[#allocation33_spill] sm:$0xff] %v3130_v2 }
 0x1a8   : > { %v1053_v45 = vmax.f32 %v1049_v15, %v1051_v34  ;;  %v1065_v47 = vpop.permute.xlu1 %1064  ;;  %v3123_v19 = vpop.permute.xlu0 %1376 }
 0x1a9   : > { %v1075_v61 = vadd.f32 %v3120_v1, %v1065_v47  ;;  %v3569_v47 = vmov 25  }
 0x1aa   : > { %v1059_v51 = vmul.f32 %v2897_v7, %v1053_v45  ;;  %2399 = vset.pattern.permute.xlu1 %v3567_v0  ;;  %v3140_v45 = vrot.slane %v3014_v55, %v3037_v42 }
 0x1ab   : > { %v1077_v25 = vmul.f32 0.2, %v1075_v61  ;;  %1458 = vperm.xlu1 %2399, %v2887_v4  }
 0x1ac   : > { %v1061_v6 = vadd.f32 %v1059_v51, %v1035_v3  ;;  %3570 = vst [vmem:[#allocation34_spill] sm:$0xff] %v3140_v45 }
 0x1ad   : > { %v1079_v31 = vmax.f32 %v1075_v61, %v1077_v25  ;;  %v1091_v63 = vpop.permute.xlu1 %1090  ;;  %v3133_v15 = vpop.permute.xlu0 %860 }
 0x1ae   : > { %v1101_v50 = vadd.f32 %v3130_v2, %v1091_v63  ;;  %v3571_v63 = vmov 26  }
 0x1af   : > { %v1085_v34 = vmul.f32 %v2905_v8, %v1079_v31  ;;  %2400 = vset.pattern.permute.xlu1 %v3569_v47  ;;  %v3150_v31 = vrot.slane %v3014_v55, %v3057_v29 }
 0x1b0   : > { %v1103_v0 = vmul.f32 0.2, %v1101_v50  ;;  %1484 = vperm.xlu1 %2400, %v2887_v4  }
 0x1b1   : > { %v1087_v7 = vadd.f32 %v1085_v34, %v1061_v6  ;;  %3572 = vst [vmem:[#allocation35_spill] sm:$0xff] %v3150_v31  ;;  %v815_v6 = vadd.f32 %v2842_v60, %v2919_v11 }
 0x1b2   : > { %v1105_v1 = vmax.f32 %v1101_v50, %v1103_v0  ;;  %v1117_v3 = vpop.permute.xlu1 %1116  ;;  %v3143_v61 = vpop.permute.xlu0 %990 }
 0x1b3   : > { %v1127_v51 = vadd.f32 %v3140_v45, %v1117_v3  ;;  %v3169_v11 = vrot.slane %v815_v6, %v3001_v53 }
 0x1b4   : > { %v1111_v25 = vmul.f32 %v2911_v9, %v1105_v1  ;;  %2401 = vset.pattern.permute.xlu1 %v3571_v63  ;;  %v3573_v63 = vmov 27   ;;  %v3162_v9 = vrot.slane %v3014_v55, %v3072_v5 }
 0x1b5   : > { %v1129_v47 = vmul.f32 0.2, %v1127_v51  ;;  %1510 = vperm.xlu1 %2401, %v2887_v4   ;;  %3576 = vst [vmem:[#allocation38_spill] sm:$0xff] %v3169_v11 }
 0x1b6   : > { %v1113_v8 = vadd.f32 %v1111_v25, %v1087_v7  ;;  %3574 = vst [vmem:[#allocation36_spill] sm:$0xff] %v3162_v9  ;;  %v3166_v7 = vrot.slane %v815_v6, %v2999_v52 }
 0x1b7   : > { %v1131_v50 = vmax.f32 %v1127_v51, %v1129_v47  ;;  %v1143_v34 = vpop.permute.xlu1 %1142  ;;  %v3155_v0 = vpop.permute.xlu0 %1016 }
 0x1b8   : > { %v1153_v3 = vadd.f32 %v3150_v31, %v1143_v34  ;;  %3575 = vst [vmem:[#allocation37_spill] sm:$0xff] %v3166_v7  ;;  %v1257_v55 = vadd.f32 %v3166_v7, %v3070_v21  ;;  %v3187_v31 = vrot.slane %v815_v6, %v3037_v42 }
 0x1b9   : > { %v1137_v1 = vmul.f32 %v2927_v13, %v1131_v50  ;;  %2402 = vset.pattern.permute.xlu1 %v3573_v63  ;;  %v1207_v50 = vmul.f32 0.2, %v3043_v30  ;;  %v1233_v63 = vmul.f32 0.2, %v3061_v27  ;;  %v1283_v13 = vadd.f32 %v3169_v11, %v3083_v41 }
 0x1ba   : > { %v1155_v45 = vmul.f32 0.2, %v1153_v3  ;;  %1536 = vperm.xlu1 %2402, %v2887_v4   ;;  %v1259_v41 = vmul.f32 0.2, %v1257_v55 }
 0x1bb   : > { %v1139_v60 = vadd.f32 %v1137_v1, %v1113_v8  ;;  %v3578_v1 = vmov 28   ;;  %v1209_v7 = vmax.f32 %v3043_v30, %v1207_v50  ;;  %v1285_v2 = vmul.f32 0.2, %v1283_v13 }
 0x1bc   : > { %v1157_v51 = vmax.f32 %v1153_v3, %v1155_v45  ;;  %v1169_v25 = vpop.permute.xlu1 %1168  ;;  %v3171_v47 = vpop.permute.xlu0 %1042  ;;  %v3183_v45 = vrot.slane %v815_v6, %v3016_v58  ;;  %v3209_v50 = vrot.slane %v815_v6, %v3072_v5 }
 0x1bd   : > { %3577 = vst [vmem:[#allocation39_spill] sm:$0xff] %v3171_v47  ;;  %v1179_v34 = vadd.f32 %v3162_v9, %v1169_v25  ;;  %v3190_v25 = vrot.slane %v815_v6, %v3018_v59  ;;  %v1235_v9 = vmax.f32 %v3061_v27, %v1233_v63  ;;  %v3199_v47 = vrot.slane %v815_v6, %v3057_v29 }
 0x1be   : > { %v1163_v8 = vmul.f32 %v2937_v18, %v1157_v51  ;;  %2403 = vset.pattern.permute.xlu1 %v3578_v1  ;;  %v1309_v51 = vadd.f32 %v3183_v45, %v3093_v44  ;;  %v3212_v27 = vrot.slane %v815_v6, %v3039_v33  ;;  %v1261_v63 = vmax.f32 %v1257_v55, %v1259_v41 }
 0x1bf   : > { %v1181_v3 = vmul.f32 0.2, %v1179_v34  ;;  %1558 = vperm.xlu1 %2403, %v2834_v49   ;;  %v1361_v44 = vadd.f32 %v3199_v47, %v3113_v56  ;;  %v1287_v59 = vmax.f32 %v1283_v13, %v1285_v2  ;;  %v1387_v6 = vadd.f32 %v3209_v50, %v3123_v19 }
 0x1c0   : > { %v1165_v21 = vadd.f32 %v1163_v8, %v1139_v60  ;;  %v1335_v8 = vadd.f32 %v3187_v31, %v3103_v23  ;;  %v3217_v23 = vadd.f32 %v2847_v62, %v2997_v16  ;;  %v3579_v55 = vmov 29  }
 0x1c1   : > { %v1183_v1 = vmax.f32 %v1179_v34, %v1181_v3  ;;  %v1403_v11 = vpop.permute.xlu1 %1402  ;;  %v3195_v18 = vpop.permute.xlu0 %1068  ;;  %v1215_v34 = vmul.f32 %v2955_v32, %v1209_v7  ;;  %v1267_v62 = vmul.f32 %v2971_v38, %v1261_v63  ;;  %v1293_v2 = vmul.f32 %v2980_v20, %v1287_v59 }
 0x1c2   : > { %v1413_v60 = vadd.f32 %v3190_v25, %v1403_v11  ;;  %v1311_v11 = vmul.f32 0.2, %v1309_v51  ;;  %v1337_v5 = vmul.f32 0.2, %v1335_v8  ;;  %v3230_v13 = vrot.slane %v3217_v23, %v2999_v52 }
 0x1c3   : > { %v1189_v30 = vmul.f32 %v2947_v26, %v1183_v1  ;;  %1562 = vperm.xlu1 %2403, %v2887_v4   ;;  %v1241_v1 = vmul.f32 %v2963_v36, %v1235_v9  ;;  %v1389_v19 = vmul.f32 0.2, %v1387_v6 }
 0x1c4   : > { %v1313_v16 = vmax.f32 %v1309_v51, %v1311_v11  ;;  %v1339_v41 = vmax.f32 %v1335_v8, %v1337_v5  ;;  %v1415_v63 = vmul.f32 0.2, %v1413_v60  ;;  %v3240_v11 = vrot.slane %v3217_v23, %v3001_v53 }
 0x1c5   : > { %v1191_v3 = vadd.f32 %v1189_v30, %v1165_v21  ;;  %v1363_v21 = vmul.f32 0.2, %v1361_v44  ;;  %v1391_v5 = vmax.f32 %v1387_v6, %v1389_v19  ;;  %v3251_v19 = vrot.slane %v3217_v23, %v3016_v58 }
 0x1c6   : > { %v1429_v29 = vpop.permute.xlu1 %1428  ;;  %v3220_v56 = vpop.permute.xlu0 %1094  ;;  %v1319_v51 = vmul.f32 %v2988_v48, %v1313_v16  ;;  %v1345_v59 = vmul.f32 %v2929_v14, %v1339_v41  ;;  %v1417_v16 = vmax.f32 %v1413_v60, %v1415_v63 }
 0x1c7   : > { %v1217_v33 = vadd.f32 %v1215_v34, %v1191_v3  ;;  %v1439_v7 = vadd.f32 %v3212_v27, %v1429_v29  ;;  %2405 = vset.pattern.permute.xlu1 %v3579_v55  ;;  %v1365_v3 = vmax.f32 %v1361_v44, %v1363_v21  ;;  %v1397_v53 = vmul.f32 %v2949_v28, %v1391_v5 }
 0x1c8   : > { %1584 = vperm.xlu1 %2405, %v2834_v49  }
 0x1c9   : > { %v1243_v9 = vadd.f32 %v1241_v1, %v1217_v33  ;;  %v1441_v1 = vmul.f32 0.2, %v1439_v7 }
 0x1cb   : > { %v1269_v30 = vadd.f32 %v1267_v62, %v1243_v9  ;;  %v1455_v34 = vpop.permute.xlu1 %1454  ;;  %v3233_v29 = vpop.permute.xlu0 %1120  ;;  %v1371_v62 = vmul.f32 %v2939_v22, %v1365_v3  ;;  %v2550_v9 = vmov 30   ;;  %v1443_v6 = vmax.f32 %v1439_v7, %v1441_v1 }
 0x1cc   : > { %v1465_v55 = vadd.f32 %v3230_v13, %v1455_v34  ;;  %1588 = vperm.xlu1 %2405, %v2887_v4  }
 0x1cd   : > { %v1295_v33 = vadd.f32 %v1293_v2, %v1269_v30  ;;  %v1449_v5 = vmul.f32 %v2965_v37, %v1443_v6 }
 0x1ce   : > { %v1467_v2 = vmul.f32 0.2, %v1465_v55 }
 0x1cf   : > { %v1321_v8 = vadd.f32 %v1319_v51, %v1295_v33  ;;  %v1423_v51 = vmul.f32 %v2957_v35, %v1417_v16 }
 0x1d0   : > { %v1481_v44 = vpop.permute.xlu1 %1480  ;;  %v3244_v21 = vpop.permute.xlu0 %1146  ;;  %2407 = vset.pattern.permute.xlu1 %v2550_v9  ;;  %v1469_v33 = vmax.f32 %v1465_v55, %v1467_v2  ;;  %v3262_v55 = vrot.slane %v3217_v23, %v3037_v42 }
 0x1d1   : > { %v1347_v34 = vadd.f32 %v1345_v59, %v1321_v8  ;;  %v1491_v30 = vadd.f32 %v3240_v11, %v1481_v44  ;;  %1610 = vperm.xlu1 %2407, %v2834_v49  }
 0x1d2   : > { %v1475_v1 = vmul.f32 %v2973_v39, %v1469_v33 }
 0x1d3   : > { %v1373_v41 = vadd.f32 %v1371_v62, %v1347_v34  ;;  %v1493_v52 = vmul.f32 0.2, %v1491_v30  ;;  %v2551_v62 = vmov 31  }
 0x1d5   : > { %v1399_v3 = vadd.f32 %v1397_v53, %v1373_v41  ;;  %v1507_v59 = vpop.permute.xlu1 %1506  ;;  %v3254_v60 = vpop.permute.xlu0 %1172  ;;  %1614 = vperm.xlu1 %2407, %v2887_v4   ;;  %v1495_v58 = vmax.f32 %v1491_v30, %v1493_v52 }
 0x1d6   : > { %v1517_v63 = vadd.f32 %v3251_v19, %v1507_v59 }
 0x1d7   : > { %v1425_v8 = vadd.f32 %v1423_v51, %v1399_v3 }
 0x1d8   : > { %v1519_v44 = vmul.f32 0.2, %v1517_v63 }
 0x1d9   : > { %v1451_v7 = vadd.f32 %v1449_v5, %v1425_v8  ;;  %2409 = vset.pattern.permute.xlu1 %v2551_v62  ;;  %v2437_v5 = vld [vmem:[%s3465_s9] ss:$0 sm:$0xff] }
 0x1da   : > { %v1533_v34 = vpop.permute.xlu1 %1532  ;;  %v3264_v16 = vpop.permute.xlu0 %1498  ;;  %1636 = vperm.xlu1 %2409, %v2834_v49   ;;  %v1521_v3 = vmax.f32 %v1517_v63, %v1519_v44 }
 0x1db   : > { %v1543_v2 = vadd.f32 %v3262_v55, %v1533_v34  ;;  %v1477_v53 = vadd.f32 %v1475_v1, %v1451_v7  ;;  %v1501_v41 = vmul.f32 %v3264_v16, %v1495_v58 }
 0x1dd   : > { %v1503_v6 = vadd.f32 %v1501_v41, %v1477_v53  ;;  %v1545_v52 = vmul.f32 0.2, %v1543_v2  ;;  %v3581_v41 = vld [vmem:[#allocation21_spill] sm:$0xff] }
 0x1de   : > { %1640 = vperm.xlu1 %2409, %v2887_v4   ;;  %v868_v4 = vadd.f32 %v3011_v40, %v3133_v15 }
 0x1df   : > { %v3270_v30 = vpop.permute.xlu0 %1524  ;;  %v830_v42 = vpop.permute.xlu1 %829  ;;  %v1547_v49 = vmax.f32 %v1543_v2, %v1545_v52  ;;  %v3580_v2 = vld [vmem:[#allocation25_spill] sm:$0xff] }
 0x1e0   : > { %v1527_v51 = vmul.f32 %v3270_v30, %v1521_v3  ;;  %v837_v33 = vadd.f32 %v3006_v54, %v830_v42  ;;  %v2158_v53 = vunpack.c.h.bf16 %v3580_v2  ;;  %v3582_v42 = vmov 0  }
 0x1e2   : > { %v1529_v59 = vadd.f32 %v1527_v51, %v1503_v6  ;;  %v839_v8 = vmul.f32 0.2, %v837_v33  ;;  %2411 = vset.pattern.permute.xlu1 %v2550_v9  ;;  %v870_v9 = vmul.f32 0.2, %v868_v4 }
 0x1e3   : > { %1628 = vperm.xlu1 %2411, %v2437_v5  }
 0x1e4   : > { %v3279_v63 = vpop.permute.xlu0 %1550  ;;  %v887_v7 = vpop.permute.xlu1 %886  ;;  %v841_v58 = vmax.f32 %v837_v33, %v839_v8  ;;  %v872_v15 = vmax.f32 %v868_v4, %v870_v9 }
 0x1e5   : > { %v1553_v1 = vmul.f32 %v3279_v63, %v1547_v49  ;;  %v894_v54 = vadd.f32 %v3025_v46, %v887_v7  ;;  %v1024_v7 = vadd.f32 %v3100_v43, %v3155_v0 }
 0x1e6   : > { %v852_v6 = vmul.f32 %v3581_v41, %v841_v58  ;;  %v878_v8 = vmul.f32 %v2913_v10, %v872_v15  ;;  %v3587_v10 = vld [vmem:[#allocation32_spill] sm:$0xff] }
 0x1e7   : > { %v3283_v44 = vadd.f32 %v1553_v1, %v1529_v59  ;;  %2412 = vset.pattern.permute.xlu1 %v2551_v62  ;;  %v896_v3 = vmul.f32 0.2, %v894_v54  ;;  %v998_v62 = vadd.f32 %v3090_v17, %v3143_v61  ;;  %v3586_v61 = vld [vmem:[#allocation30_spill] sm:$0xff]  ;;  %v1076_v41 = vadd.f32 %v3587_v10, %v3195_v18  ;;  %v3591_v18 = vld [vmem:[#allocation13_spill] sm:$0xff] }
 0x1e8   : > { %1654 = vperm.xlu1 %2412, %v2437_v5   ;;  %v854_v51 = vadd.f32 %v2158_v53, %v852_v6  ;;  %v3585_v53 = vld [vmem:[#allocation11_spill] sm:$0xff]  ;;  %v1026_v6 = vmul.f32 0.2, %v1024_v7 }
 0x1e9   : > { %v913_v34 = vpop.permute.xlu1 %912  ;;  %v898_v33 = vmax.f32 %v894_v54, %v896_v3  ;;  %v1000_v1 = vmul.f32 0.2, %v998_v62  ;;  %v3583_v54 = vld [vmem:[#allocation39_spill] sm:$0xff] }
 0x1ea   : > { %v920_v40 = vadd.f32 %v3048_v24, %v913_v34  ;;  %v880_v24 = vadd.f32 %v878_v8, %v854_v51  ;;  %v3584_v34 = vld [vmem:[#allocation31_spill] sm:$0xff]  ;;  %v1028_v8 = vmax.f32 %v1024_v7, %v1026_v6  ;;  %v3595_v7 = vld [vmem:[#allocation36_spill] sm:$0xff] }
 0x1eb   : > { %v904_v4 = vmul.f32 %v2921_v12, %v898_v33  ;;  %v1050_v2 = vadd.f32 %v3584_v34, %v3583_v54  ;;  %v1002_v15 = vmax.f32 %v998_v62, %v1000_v1  ;;  %v1180_v6 = vadd.f32 %v3595_v7, %v3254_v60 }
 0x1ec   : > { %v922_v52 = vmul.f32 0.2, %v920_v40  ;;  %2413 = vset.pattern.permute.xlu1 %v3582_v42 }
 0x1ed   : > { %v906_v3 = vadd.f32 %v904_v4, %v880_v24  ;;  %v1052_v12 = vmul.f32 0.2, %v1050_v2  ;;  %v3592_v24 = vld [vmem:[#allocation35_spill] sm:$0xff] }
 0x1ee   : > { %v939_v46 = vpop.permute.xlu1 %938  ;;  %v924_v49 = vmax.f32 %v920_v40, %v922_v52  ;;  %v3588_v40 = vld [vmem:[#allocation12_spill] sm:$0xff]  ;;  %v3589_v52 = vld [vmem:[#allocation33_spill] sm:$0xff]  ;;  %v1154_v4 = vadd.f32 %v3592_v24, %v3244_v21 }
 0x1ef   : > { %v946_v59 = vadd.f32 %v3066_v57, %v939_v46  ;;  %v1102_v42 = vadd.f32 %v3589_v52, %v3220_v56  ;;  %v1054_v1 = vmax.f32 %v1050_v2, %v1052_v12  ;;  %v3597_v21 = vld [vmem:[#allocation24_spill] sm:$0xff] }
 0x1f0   : > { %v930_v17 = vmul.f32 %v3585_v53, %v924_v49  ;;  %v3590_v49 = vld [vmem:[#allocation34_spill] sm:$0xff] }
 0x1f1   : > { %v948_v5 = vmul.f32 0.2, %v946_v59  ;;  %v1104_v34 = vmul.f32 0.2, %v1102_v42 }
 0x1f2   : > { %v932_v51 = vadd.f32 %v930_v17, %v906_v3  ;;  %v1156_v3 = vmul.f32 0.2, %v1154_v4 }
 0x1f3   : > { %v950_v58 = vmax.f32 %v946_v59, %v948_v5  ;;  %v965_v9 = vpop.permute.xlu1 %964  ;;  %v1078_v59 = vmul.f32 0.2, %v1076_v41  ;;  %v1128_v5 = vadd.f32 %v3590_v49, %v3233_v29 }
 0x1f4   : > { %v972_v57 = vadd.f32 %v3586_v61, %v965_v9  ;;  %v3594_v61 = vld [vmem:[#allocation15_spill] sm:$0xff] }
 0x1f5   : > { %v956_v43 = vmul.f32 %v3588_v40, %v950_v58  ;;  %v3593_v58 = vld [vmem:[#allocation14_spill] sm:$0xff]  ;;  %v1080_v56 = vmax.f32 %v1076_v41, %v1078_v59  ;;  %v1130_v10 = vmul.f32 0.2, %v1128_v5  ;;  %v3596_v40 = vld [vmem:[#allocation16_spill] sm:$0xff]  ;;  %v3599_v59 = vld [vmem:[#allocation27_spill] sm:$0xff] }
 0x1f6   : > { %v974_v0 = vmul.f32 0.2, %v972_v57  ;;  %v1008_v62 = vmul.f32 %v3593_v58, %v1002_v15  ;;  %v3598_v15 = vld [vmem:[#allocation17_spill] sm:$0xff] }
 0x1f7   : > { %v958_v9 = vadd.f32 %v956_v43, %v932_v51  ;;  %v1060_v43 = vmul.f32 %v3596_v40, %v1054_v1  ;;  %v1086_v2 = vmul.f32 %v3598_v15, %v1080_v56  ;;  %v1132_v12 = vmax.f32 %v1128_v5, %v1130_v10  ;;  %v3601_v58 = vld [vmem:[#allocation37_spill] sm:$0xff]  ;;  %v3602_v1 = vld [vmem:[#allocation19_spill] sm:$0xff] }
 0x1f8   : > { %v976_v33 = vmax.f32 %v972_v57, %v974_v0  ;;  %v1199_v46 = vpop.permute.xlu1 %1198  ;;  %v1034_v57 = vmul.f32 %v3594_v61, %v1028_v8  ;;  %v1106_v0 = vmax.f32 %v1102_v42, %v1104_v34  ;;  %v3603_v61 = vld [vmem:[#allocation20_spill] sm:$0xff] }
 0x1f9   : > { %v1206_v51 = vadd.f32 %v3597_v21, %v1199_v46  ;;  %v1138_v42 = vmul.f32 %v3602_v1, %v1132_v12 }
 0x1fa   : > { %v982_v54 = vmul.f32 %v3591_v18, %v976_v33  ;;  %v1182_v33 = vmul.f32 0.2, %v1180_v6  ;;  %v3600_v18 = vld [vmem:[#allocation18_spill] sm:$0xff] }
 0x1fb   : > { %v1208_v24 = vmul.f32 0.2, %v1206_v51 }
 0x1fc   : > { %v984_v53 = vadd.f32 %v982_v54, %v958_v9  ;;  %v1158_v9 = vmax.f32 %v1154_v4, %v1156_v3  ;;  %v1112_v54 = vmul.f32 %v3600_v18, %v1106_v0  ;;  %v1184_v34 = vmax.f32 %v1180_v6, %v1182_v33 }
 0x1fd   : > { %v1225_v17 = vpop.permute.xlu1 %1224  ;;  %v1210_v10 = vmax.f32 %v1206_v51, %v1208_v24 }
 0x1fe   : > { %v1010_v29 = vadd.f32 %v1008_v62, %v984_v53  ;;  %v1232_v49 = vadd.f32 %v3599_v59, %v1225_v17  ;;  %v1164_v56 = vmul.f32 %v3603_v61, %v1158_v9  ;;  %v3604_v17 = vld [vmem:[#allocation38_spill] sm:$0xff]  ;;  %v1190_v4 = vmul.f32 %v2947_v26, %v1184_v34 }
 0x200   : > { %v1036_v52 = vadd.f32 %v1034_v57, %v1010_v29  ;;  %v1234_v46 = vmul.f32 0.2, %v1232_v49 }
 0x202   : > { %v1062_v41 = vadd.f32 %v1060_v43, %v1036_v52  ;;  %v1251_v8 = vpop.permute.xlu1 %1250  ;;  %v1236_v40 = vmax.f32 %v1232_v49, %v1234_v46  ;;  %v1216_v52 = vmul.f32 %v2955_v32, %v1210_v10 }
 0x203   : > { %v1258_v62 = vadd.f32 %v3601_v58, %v1251_v8 }
 0x204   : > { %v1088_v60 = vadd.f32 %v1086_v2, %v1062_v41  ;;  %v1242_v12 = vmul.f32 %v2963_v36, %v1236_v40 }
 0x205   : > { %v1260_v7 = vmul.f32 0.2, %v1258_v62 }
 0x206   : > { %v1114_v53 = vadd.f32 %v1112_v54, %v1088_v60 }
 0x207   : > { %v1277_v5 = vpop.permute.xlu1 %1276  ;;  %v1262_v21 = vmax.f32 %v1258_v62, %v1260_v7 }
 0x208   : > { %v1140_v57 = vadd.f32 %v1138_v42, %v1114_v53  ;;  %v1284_v29 = vadd.f32 %v3604_v17, %v1277_v5 }
 0x209   : > { %v1268_v59 = vmul.f32 %v2971_v38, %v1262_v21 }
 0x20a   : > { %v1166_v3 = vadd.f32 %v1164_v56, %v1140_v57  ;;  %v1286_v43 = vmul.f32 0.2, %v1284_v29 }
 0x20c   : > { %v1192_v0 = vadd.f32 %v1190_v4, %v1166_v3  ;;  %v1303_v6 = vpop.permute.xlu1 %1302  ;;  %v1288_v33 = vmax.f32 %v1284_v29, %v1286_v43 }
 0x20d   : > { %v1310_v15 = vadd.f32 %v3183_v45, %v1303_v6 }
 0x20e   : > { %v1218_v2 = vadd.f32 %v1216_v52, %v1192_v0  ;;  %v1294_v49 = vmul.f32 %v2980_v20, %v1288_v33 }
 0x20f   : > { %v1312_v51 = vmul.f32 0.2, %v1310_v15 }
 0x210   : > { %v1244_v41 = vadd.f32 %v1242_v12, %v1218_v2 }
 0x211   : > { %v1314_v8 = vmax.f32 %v1310_v15, %v1312_v51  ;;  %v1329_v26 = vpop.permute.xlu1 %1328 }
 0x212   : > { %v1270_v9 = vadd.f32 %v1268_v59, %v1244_v41  ;;  %v1336_v18 = vadd.f32 %v3187_v31, %v1329_v26  ;;  %v3605_v26 = vld [vmem:[#allocation28_spill] sm:$0xff] }
 0x213   : > { %v1320_v32 = vmul.f32 %v2988_v48, %v1314_v8 }
 0x214   : > { %v1296_v54 = vadd.f32 %v1294_v49, %v1270_v9  ;;  %v1338_v60 = vmul.f32 0.2, %v1336_v18 }
 0x216   : > { %v1322_v45 = vadd.f32 %v1320_v32, %v1296_v54  ;;  %v1340_v24 = vmax.f32 %v1336_v18, %v1338_v60  ;;  %v1355_v58 = vpop.permute.xlu1 %1354  ;;  %v1577_v54 = vpop.permute.xlu0 %1576 }
 0x217   : > { %v1362_v36 = vadd.f32 %v3199_v47, %v1355_v58 }
 0x218   : > { %v1346_v62 = vmul.f32 %v2929_v14, %v1340_v24 }
 0x219   : > { %v1364_v1 = vmul.f32 0.2, %v1362_v36 }
 0x21a   : > { %v1348_v38 = vadd.f32 %v1346_v62, %v1322_v45 }
 0x21b   : > { %v1366_v42 = vmax.f32 %v1362_v36, %v1364_v1  ;;  %v1381_v34 = vpop.permute.xlu1 %1380  ;;  %v3606_v36 = vld [vmem:[#allocation29_spill] sm:$0xff] }
 0x21c   : > { %v1388_v53 = vadd.f32 %v3209_v50, %v1381_v34 }
 0x21d   : > { %v1372_v20 = vmul.f32 %v2939_v22, %v1366_v42 }
 0x21e   : > { %v1390_v31 = vmul.f32 0.2, %v1388_v53 }
 0x21f   : > { %v1374_v46 = vadd.f32 %v1372_v20, %v1348_v38 }
 0x220   : > { %v1392_v48 = vmax.f32 %v1388_v53, %v1390_v31  ;;  %v1407_v61 = vpop.permute.xlu1 %1406  ;;  %v1603_v31 = vpop.permute.xlu0 %1602 }
 0x221   : > { %v1414_v56 = vadd.f32 %v3190_v25, %v1407_v61 }
 0x222   : > { %v1398_v5 = vmul.f32 %v2949_v28, %v1392_v48 }
 0x223   : > { %v1416_v57 = vmul.f32 0.2, %v1414_v56 }
 0x224   : > { %v1400_v47 = vadd.f32 %v1398_v5, %v1374_v46 }
 0x225   : > { %v1418_v10 = vmax.f32 %v1414_v56, %v1416_v57  ;;  %v1433_v14 = vpop.permute.xlu1 %1432 }
 0x226   : > { %v1440_v7 = vadd.f32 %v3212_v27, %v1433_v14 }
 0x227   : > { %v1424_v17 = vmul.f32 %v2957_v35, %v1418_v10 }
 0x228   : > { %v1442_v29 = vmul.f32 0.2, %v1440_v7 }
 0x229   : > { %v1426_v50 = vadd.f32 %v1424_v17, %v1400_v47  ;;  %v3607_v17 = vld [vmem:[#allocation23_spill] sm:$0xff] }
 0x22a   : > { %v1444_v4 = vmax.f32 %v1440_v7, %v1442_v29  ;;  %v1459_v22 = vpop.permute.xlu1 %1458 }
 0x22b   : > { %v1466_v3 = vadd.f32 %v3230_v13, %v1459_v22  ;;  %v3608_v22 = vld [vmem:[#allocation26_spill] sm:$0xff] }
 0x22c   : > { %v1450_v40 = vmul.f32 %v2965_v37, %v1444_v4 }
 0x22d   : > { %v1468_v43 = vmul.f32 0.2, %v1466_v3 }
 0x22e   : > { %v1452_v25 = vadd.f32 %v1450_v40, %v1426_v50 }
 0x22f   : > { %v1470_v0 = vmax.f32 %v1466_v3, %v1468_v43  ;;  %v1485_v28 = vpop.permute.xlu1 %1484  ;;  %v1646_v3 = vrot.slane %v3217_v23, %v3608_v22 }
 0x230   : > { %v1492_v52 = vadd.f32 %v3240_v11, %v1485_v28 }
 0x231   : > { %v1476_v21 = vmul.f32 %v2973_v39, %v1470_v0  ;;  %v1568_v39 = vrot.slane %v3217_v23, %v3605_v26 }
 0x232   : > { %v1494_v6 = vmul.f32 0.2, %v1492_v52 }
 0x233   : > { %v1478_v27 = vadd.f32 %v1476_v21, %v1452_v25 }
 0x234   : > { %v1496_v15 = vmax.f32 %v1492_v52, %v1494_v6  ;;  %v1511_v35 = vpop.permute.xlu1 %1510 }
 0x235   : > { %v1518_v2 = vadd.f32 %v3251_v19, %v1511_v35 }
 0x236   : > { %v1502_v12 = vmul.f32 %v3264_v16, %v1496_v15 }
 0x237   : > { %v1520_v33 = vmul.f32 0.2, %v1518_v2 }
 0x238   : > { %v1504_v13 = vadd.f32 %v1502_v12, %v1478_v27 }
 0x239   : > { %v1522_v51 = vmax.f32 %v1518_v2, %v1520_v33  ;;  %v1537_v37 = vpop.permute.xlu1 %1536 }
 0x23a   : > { %v1544_v41 = vadd.f32 %v3262_v55, %v1537_v37 }
 0x23b   : > { %v1528_v59 = vmul.f32 %v3270_v30, %v1522_v51  ;;  %v1594_v30 = vrot.slane %v3217_v23, %v3606_v36 }
 0x23c   : > { %v1546_v8 = vmul.f32 0.2, %v1544_v41 }
 0x23d   : > { %v1530_v11 = vadd.f32 %v1528_v59, %v1504_v13 }
 0x23e   : > { %v1548_v9 = vmax.f32 %v1544_v41, %v1546_v8  ;;  %v1559_v49 = vpop.permute.xlu1 %1558 }
 0x23f   : > { %v1569_v18 = vadd.f32 %v1568_v39, %v1559_v49 }
 0x240   : > { %v1554_v19 = vmul.f32 %v3279_v63, %v1548_v9 }
 0x241   : > { %v1571_v32 = vmul.f32 0.2, %v1569_v18 }
 0x242   : > { %v1563_v16 = vpop.permute.xlu1 %1562  ;;  %v1556_v60 = vadd.f32 %v1554_v19, %v1530_v11 }
 0x243   : > { %v1573_v45 = vmax.f32 %v1569_v18, %v1571_v32  ;;  %v1570_v24 = vadd.f32 %v1568_v39, %v1563_v16 }
 0x245   : > { %v1572_v58 = vmul.f32 0.2, %v1570_v24  ;;  %v1579_v55 = vmul.f32 %v1577_v54, %v1573_v45 }
 0x247   : > { %v1574_v62 = vmax.f32 %v1570_v24, %v1572_v58  ;;  %v1581_v1 = vadd.f32 %v1579_v55, %v3283_v44  ;;  %v1585_v38 = vpop.permute.xlu1 %1584  ;;  %v1620_v44 = vrot.slane %v3217_v23, %v3607_v17  ;;  %v2417_v24 = vld [vmem:[%s3467_s11] sm:$0xff]   ;;  %v3609_v58 = vmov 0.0  }
 0x248   : > { %v1595_v42 = vadd.f32 %v1594_v30, %v1585_v38  ;;  %2203 = vmatpush3.bf16.msra.mxu0 %v2417_v24  ;;  %v1877_v17 = vld [vmem:[%s3469_s13] sm:$0x1] }
 0x249   : > { %v1580_v34 = vmul.f32 %v1577_v54, %v1574_v62  ;;  %2204 = vmatprep.subr.bf16.mxu0 %v3609_v58 }
 0x24a   : > { %v1597_v53 = vmul.f32 0.2, %v1595_v42 }
 0x24b   : > { %v1582_v20 = vadd.f32 %v1580_v34, %v1556_v60  ;;  %v1589_v63 = vpop.permute.xlu1 %1588  ;;  %v2418_v34 = vld [vmem:[%s3467_s11 + $0x8] sm:$0xff]  }
 0x24c   : > { %v1599_v46 = vmax.f32 %v1595_v42, %v1597_v53  ;;  %v1596_v48 = vadd.f32 %v1594_v30, %v1589_v63  ;;  %v2419_v53 = vld [vmem:[%s3471_s15] sm:$0xff]   ;;  %2205 = vmatpush3.bf16.msra.mxu0 %v2418_v34  ;;  %v1878_v63 = vld [vmem:[#allocation5] sm:$0x1] }
 0x24d   : > { %2218 = vmatprep.subr.bf16.mxu0 %v3609_v58 }
 0x24e   : > { %v1598_v61 = vmul.f32 0.2, %v1596_v48  ;;  %v1605_v56 = vmul.f32 %v1603_v31, %v1599_v46 }
 0x250   : > { %v1600_v5 = vmax.f32 %v1596_v48, %v1598_v61  ;;  %v1607_v57 = vadd.f32 %v1605_v56, %v1581_v1  ;;  %v1611_v47 = vpop.permute.xlu1 %1610 }
 0x251   : > { %v1621_v29 = vadd.f32 %v1620_v44, %v1611_v47 }
 0x252   : > { %v1606_v10 = vmul.f32 %v1603_v31, %v1600_v5  ;;  %v2133_v31 = vld [vmem:[%s3466_s10] ss:$0 sm:$0xff] }
 0x253   : > { %v1623_v40 = vmul.f32 0.2, %v1621_v29 }
 0x254   : > { %v1608_v14 = vadd.f32 %v1606_v10, %v1582_v20  ;;  %v1615_v7 = vpop.permute.xlu1 %1614  ;;  %v2420_v20 = vld [vmem:[%s3471_s15 + $0x8] sm:$0xff]  }
 0x255   : > { %v1622_v50 = vadd.f32 %v1620_v44, %v1615_v7  ;;  %v1625_v52 = vmax.f32 %v1621_v29, %v1623_v40  ;;  %v2147_v44 = vld [vmem:[#allocation7] ss:$0 sm:$0xff]  ;;  %v2139_v29 = vld [vmem:[#allocation6] ss:$0 sm:$0xff] }
 0x257   : > { %v1624_v43 = vmul.f32 0.2, %v1622_v50 }
 0x259   : > { %v1637_v4 = vpop.permute.xlu1 %1636  ;;  %v1626_v21 = vmax.f32 %v1622_v50, %v1624_v43  ;;  %v2135_v50 = vld [vmem:[%s3468_s12] ss:$0 sm:$0xff] }
 0x25a   : > { %v1647_v0 = vadd.f32 %v1646_v3, %v1637_v4 }
 0x25c   : > { %v1649_v6 = vmul.f32 0.2, %v1647_v0 }
 0x25d   : > { %v1641_v25 = vpop.permute.xlu1 %1640 }
 0x25e   : > { %v1648_v28 = vadd.f32 %v1646_v3, %v1641_v25  ;;  %v1651_v13 = vmax.f32 %v1647_v0, %v1649_v6 }
 0x260   : > { %v1650_v27 = vmul.f32 0.2, %v1648_v28 }
 0x262   : > { %v1629_v15 = vpop.permute.xlu1 %1628  ;;  %v1652_v51 = vmax.f32 %v1648_v28, %v1650_v27 }
 0x263   : > { %v1631_v35 = vmul.f32 %v1629_v15, %v1625_v52  ;;  %v1632_v2 = vmul.f32 %v1629_v15, %v1626_v21 }
 0x265   : > { %v1633_v12 = vadd.f32 %v1631_v35, %v1607_v57  ;;  %v1634_v33 = vadd.f32 %v1632_v2, %v1608_v14  ;;  %v3610_v2 = vld [vmem:[#allocation22_spill] sm:$0xff] }
 0x267   : > { %v1655_v37 = vpop.permute.xlu1 %1654 }
 0x268   : > { %v1657_v41 = vmul.f32 %v1655_v37, %v1651_v13  ;;  %v1658_v59 = vmul.f32 %v1655_v37, %v1652_v51 }
 0x26a   : > { %v1660_v23 = vadd.f32 %v1658_v59, %v1634_v33  ;;  %v1659_v8 = vadd.f32 %v1657_v41, %v1633_v12 }
 0x26c   : > { %v1665_v11 = vsel %vm1661_vm3, %v1660_v23, -inf  ;;  %v1662_v26 = vsel %vm1661_vm3, %v1659_v8, -inf }
 0x26d   : > { %1666 = vmax.xlane.f32.xlu1 %v1665_v11  ;;  %1663 = vmax.xlane.f32.xlu0 %v1662_v26  ;;  %v1943_v26 = vld [vmem:[%s1942_s1] sm:$0xf]  ;;  %s2058_s1 = sshll.u32 %s600_s21, 4  ;;  %s3411_s1 = int_to_ptr.vmem [resolvable:$true] %s2058_s1 }
 0x26e   : > { %s2438_s6 = scalar_lea.vmem %s3411_s1, 128  ;;  %p2445_p0 = scmp.lt.s32.totalorder %s3411_s1, %s2443_s7 }
 0x26f   : > { %p2439_p11 = scmp.ne.s32.totalorder %s3411_s1, %s2438_s6  ;;  %p2446_p1 = scmp.lt.s32.totalorder %s2444_s8, %s2438_s6 }
 0x271   : > { %p2440_p12 = pnand %p2439_p11, %p2702_p4  ;;  %p2447_p2 = por %p2446_p1, %p2445_p0 }
 0x273   : > { %p2441_p13 = pneg %p2440_p12 }
 0x275   : > { %p2448_p3 = pnand %p2447_p2, %p2441_p13 }
 0x27e   : > { %1881 = vperm.xlu1 %2413, %v1878_v63  }
 0x282   : > { %1965 = vperm.xlu1 %2413, %v2147_v44  }
 0x2fa   : > { %v1667_v39 = vpop.xlane.xlu1 %1666  ;;  %v1664_v9 = vpop.xlane.xlu0 %1663 }
 0x2fb   : > { %v1669_v49 = vsub.f32 %v1660_v23, %v1667_v39  ;;  %v1668_v18 = vsub.f32 %v1659_v8, %v1664_v9 }
 0x2fd   : > { %v1670_v19 = vmul.f32 1.442695, %v1668_v18  ;;  %v1672_v32 = vmul.f32 1.442695, %v1669_v49  ;;  %v1944_v49 = vunpack.c.l.bf16 %v1943_v26 }
 0x2fe   : > { %v1882_v15 = vpop.permute.xlu1 %1881 }
 0x2ff   : > { %2421 = vpow2.f32 %v1670_v19  ;;  %v1887_v12 = vrot.slane %v1882_v15, %v3610_v2 }
 0x300   : > { %2423 = vpow2.f32 %v1672_v32 }
 0x302   : > { %v1966_v18 = vpop.permute.xlu1 %1965 }
 0x309   : > { %v2422_v16 = vpop.eup %2421 }
 0x30a   : > { %v1674_v54 = vsel %vm1661_vm3, %v2422_v16, 0.0  ;;  %v2424_v60 = vpop.eup %2423 }
 0x30b   : > { %1675 = vadd.xlane.f32.xlu0 %v1674_v54  ;;  %v1677_v45 = vsel %vm1661_vm3, %v2424_v60, 0.0 }
 0x30f   : > { %1678 = vadd.xlane.f32.xlu0 %v1677_v45 }
 0x398   : > { %v1676_v55 = vpop.xlane.xlu0 %1675 }
 0x399   : > { %2425 = vrcp.f32 %v1676_v55 }
 0x39c   : > { %v1679_v36 = vpop.xlane.xlu0 %1678 }
 0x39d   : > { %2427 = vrcp.f32 %v1679_v36 }
 0x3a3   : > { %v2426_v30 = vpop.eup %2425 }
 0x3a4   : > { %v1682_v1 = vmul.f32 %v2426_v30, %v2422_v16 }
 0x3a7   : > { %v2428_v62 = vpop.eup %2427 }
 0x3a8   : > { %v1683_v38 = vmul.f32 %v2428_v62, %v2424_v60 }
 0x3aa   : > { %v1684_v42 = vpack.c.bf16 %v1683_v38, %v1682_v1  ;;  %v2148_v1 = vld [vmem:[%s3472_s18] ss:$0 sm:$0xff] }
 0x3ac   : > { %2199 = vmatmul.mubr.msk.bf16.vlgmr.msra.gmra.mrb[4].mxu1 %vm1661_vm3, %v1684_v42 }
 0x3ad   : > { %2214 = vmatprep.mubr.msk.bf16.mxu1 %vm2519_vm1, %v3609_v58  ;;  %2211 = vmatpush3.bf16.msra.mxu1 %v2419_v53 }
 0x3ae   : > { %2212 = vmatprep.subr.bf16.mxu1 %v3609_v58 }
 0x3b1   : > { %2213 = vmatpush3.bf16.msra.mxu1 %v2420_v20 }
 0x3b2   : > { %2224 = vmatprep.subr.bf16.mxu1 %v3609_v58 }
 0x47f   : > { %v1730_v46 = vpop.f32.mrb[4].mxu1 }
 0x480   : > { %v1731_v48 = vadd.f32 %v2133_v31, %v1730_v46  ;;  %v2200_v61 = vpop.f32.mrb[5].mxu1 }
 0x481   : > { %v1733_v56 = vpop.f32.mrb[6].mxu1 }
 0x482   : > { %v1734_v5 = vadd.f32 %v2133_v31, %v1733_v56  ;;  %v2201_v57 = vpop.f32.mrb[7].mxu1  ;;  %v1737_v47 = vmax.f32 %v1731_v48, 0.0 }
 0x484   : > { %v1738_v10 = vmax.f32 %v1734_v5, 0.0 }
 0x486   : > { %v1739_v14 = vpack.c.bf16 %v1738_v10, %v1737_v47 }
 0x488   : > { %2207 = vmatmul.mubr.msk.bf16.vlgmr.msra.gmra.mrb[8].mxu0 %vm1763_vm4, %v1739_v14  ;;  %2215 = vmatmul.mubr.msk.bf16.vlgmr.msra.gmra.mrb[8].mxu1 %vm1763_vm4, %v1739_v14  ;;  %v1765_v7 = vsel %vm1763_vm4, %v1739_v14, 0 }
 0x489   : > { %2219 = vmatpush3.bf16.xpose.msra.mxu0 %v1765_v7  ;;  %2220 = vmatprep.mubr.msk.bf16.mxu0 %vm2519_vm1, %v3609_v58 }
 0x48a   : > { %2226 = vmatprep.mubr.msk.bf16.mxu1 %vm2519_vm1, %v3609_v58 }
 0x490   : > { %2221 = vmatmul.mubr.msk.bf16.vlgmr.msra.gmra.mrb[12].mxu0 %vm1763_vm4, %v1877_v17 }
 0x55b   : > { %v1801_v4 = vpop.f32.mrb[8].mxu0  ;;  %v1867_v22 = vpop.f32.mrb[8].mxu1 }
 0x55c   : > { %v1868_v3 = vadd.f32 %v2139_v29, %v1867_v22  ;;  %v2208_v40 = vpop.f32.mrb[9].mxu0  ;;  %v2216_v43 = vpop.f32.mrb[9].mxu1  ;;  %v1802_v28 = vadd.f32 %v2135_v50, %v1801_v4 }
 0x55d   : > { %v1804_v25 = vpop.f32.mrb[10].mxu0  ;;  %v1870_v0 = vpop.f32.mrb[10].mxu1 }
 0x55e   : > { %1875 = vst.msk [vmem:[#allocation4] sm:$0xff] %vm1874_vm5, %v1868_v3  ;;  %v1805_v52 = vadd.f32 %v2135_v50, %v1804_v25  ;;  %v1871_v21 = vadd.f32 %v2139_v29, %v1870_v0  ;;  %v2209_v6 = vpop.f32.mrb[11].mxu0  ;;  %v2217_v27 = vpop.f32.mrb[11].mxu1 }
 0x560   : > { %v1985_v35 = vpack.c.bf16 %v1805_v52, %v1802_v28  ;;  %1876 = vst.msk [vmem:[#allocation4 + $0x8] sm:$0xff] %vm1874_vm5, %v1871_v21 }
 0x562   : > { %2225 = vmatpush3.bf16.msra.mxu1 %v1985_v35 }
 0x563   : > { %v1925_v33 = vpop.f32.mrb[12].mxu0 }
 0x564   : > { %v1926_v13 = vadd.f32 %v1925_v33, %v1887_v12  ;;  %v2222_v51 = vpop.f32.mrb[13].mxu0 }
 0x565   : > { %v1928_v37 = vpop.f32.mrb[14].mxu0 }
 0x566   : > { %1932 = vst.msk [vmem:[#allocation3] sm:$0x1] %vm1931_vm6, %v1926_v13  ;;  %v2223_v41 = vpop.f32.mrb[15].mxu0 }
 0x567   : > { %v1936_v59 = vld [vmem:[%s1935_s3] sm:$0xff]  ;;  %s2044_s3 = scalar_lea.sflag [#allocation9], %s598_s27 }
 0x568   : > { %1947 = vperm.xlu0 %2414, %v1936_v59  }
 0x56d   : > { %v2146_v23 = vld [vmem:[#allocation3] ss:$0 sm:$0xff] }
 0x5e7   : > { %v1948_v8 = vpop.permute.xlu0 %1947 }
 0x5e8   : > { %v1956_v11 = vadd.f32 %v2146_v23, %v1948_v8 }
 0x5ea   : > { %v1957_v39 = vmul.f32 0.2, %v1956_v11 }
 0x5ec   : > { %v1958_v9 = vmax.f32 %v1956_v11, %v1957_v39 }
 0x5ee   : > { %v1968_v19 = vmul.f32 %v1966_v18, %v1958_v9 }
 0x5f0   : > { %v1969_v32 = vadd.f32 %v1968_v19, %v1944_v49 }
 0x5f2   : > { %v1971_v16 = vsel %vm1661_vm3, %v1969_v32, -inf }
 0x5f3   : > { %1972 = vmax.xlane.f32.xlu1 %v1971_v16 }
 0x680   : > { %v1973_v54 = vpop.xlane.xlu1 %1972 }
 0x681   : > { %v1974_v60 = vsub.f32 %v1969_v32, %v1973_v54 }
 0x683   : > { %v1975_v45 = vmul.f32 1.442695, %v1974_v60 }
 0x685   : > { %2429 = vpow2.f32 %v1975_v45 }
 0x68f   : > { %v2430_v24 = vpop.eup %2429 }
 0x690   : > { %v1977_v58 = vsel %vm1661_vm3, %v2430_v24, 0.0 }
 0x691   : > { %1978 = vadd.xlane.f32.xlu0 %v1977_v58 }
 0x71e   : > { %v1979_v55 = vpop.xlane.xlu0 %1978 }
 0x71f   : > { %2431 = vrcp.f32 %v1979_v55 }
 0x729   : > { %v2432_v36 = vpop.eup %2431 }
 0x72a   : > { %v1981_v30 = vmul.f32 %v2432_v36, %v2430_v24 }
 0x72c   : > { %v1982_v62 = vpack.c.bf16 %v1981_v30, %v1981_v30 }
 0x72e   : > { %2227 = vmatmul.mubr.msk.bf16.vlgmr.msra.gmra.mrb[12].mxu1 %vm1661_vm3, %v1982_v62 }
 0x801   : > { %v2030_v38 = vpop.f32.mrb[12].mxu1 }
 0x802   : > { %v2031_v42 = vadd.f32 %v2148_v1, %v2030_v38  ;;  %v2228_v34 = vpop.f32.mrb[13].mxu1 }
 0x803   : > { %v2033_v53 = vpop.f32.mrb[14].mxu1 }
 0x804   : > { %v2150_v20 = vmul.f32 -1.442695, %v2031_v42  ;;  %v2229_v63 = vpop.f32.mrb[15].mxu1 }
 0x806   : > { %2433 = vpow2.f32 %v2150_v20 }
 0x810   : > { %v2434_v31 = vpop.eup %2433 }
 0x811   : > { %v2039_v46 = vadd.f32 1.0, %v2434_v31 }
 0x813   : > { %2435 = vrcp.f32 %v2039_v46 }
 0x81d   : > { %v2436_v48 = vpop.eup %2435 }
 0x81e   : > { %2042 = vst [vmem:[%s600_s21] sm:$0xff] %v2436_v48 }
 0x81f   : > { %2451 = shalt.err (!%p2448_p3)
}
 0x820   : > { %s2452_s4 = scalar_lea.hbm %s3409_s22, 128  ;;  %s2456_s29 = scalar_lea.hbm %s3473_s19, 256 }
 0x821   : > { %p2453_p5 = scmp.ne.s32.totalorder %s3409_s22, %s2452_s4  ;;  %p2457_p9 = scmp.lt.u32.totalorder %s3409_s22, %s3473_s19 }
 0x822   : > { %p2458_p10 = scmp.lt.u32.totalorder %s2456_s29, %s2452_s4  ;;  %p2460_p12 = scmp.lt.u32.totalorder %s2452_s4, %s3409_s22 }
 0x823   : > { %p2454_p6 = pnand %p2453_p5, %p2702_p4 }
 0x824   : > { %p2459_p11 = por %p2458_p10, %p2457_p9 }
 0x825   : > { %p2455_p7 = pneg %p2454_p6 }
 0x826   : > { %p2461_p13 = por %p2460_p12, %p2459_p11 }
 0x828   : > { %p2462_p0 = pnand %p2461_p13, %p2455_p7 }
 0x82a   : > { %2465 = shalt.err (!%p2462_p0)
}
 0x82b   : > { %2231 = dma.vmem_to_hbm [thread:$0]  (%p2702_p4), %s3411_s1, 128, %s3409_s22, %s2044_s3  }
 0x82c PF: > { %p2237_p1 = scmp.ge.s32.totalorder %s2516_s16, 2  ;;  %s2070_s6 = sand.u32 1, %s2496_s2  }
 0x82d   : > { %s2071_s8 = scalar_lea.sflag [#allocation9], %s2070_s6 }
 0x82e   : > { %p2234_p2 = pnand %p2237_p1, %p2709_p8 }
 0x830   : > { %2491 = dma.done.wait (!%p2234_p2), %s2071_s8, 128  }
 0x831   : > { %2493 = vsyncadd (!%p2234_p2), %s2071_s8, 4294967168  ;;  %s38_s16 = sadd.s32 1, %s2516_s16   ;;  %s3611_s2 = smov %s2500_s23 }
 0x832   : > { %p35_p3 = scmp.ge.s32.totalorder %s38_s16, 4   ;;  %s3612_s23 = smov %s2504_s24 }
 0x833   : > { %s3613_s24 = smov %s2715_s30  ;;  %s3614_s14 = smov %s2512_s25 }
 0x834   : > { %s3615_s25 = smov %s3617_s26  ;;  %37 = sbr.rel (!%p35_p3) target bundleno = 14 (0xe), region = 134 }
 0x83b   :  { %2076 = vsyncpa [#allocation9], 1 }
 0x83c   :  { %2078 = vsyncpa [#allocation9 + $0x1], 1 }

</bundles_post_ra>
